<compile_context>
chip_gen: v6e
topology: v6e:2x2x1
jax: 0.10.0
libtpu: 0.0.40
codegen_flags: <defaults>
</compile_context>

<pallas_src>
import math
import functools

import jax
import jax.numpy as jnp
from jax.experimental import pallas as pl
from jax.experimental.pallas import tpu as pltpu


# ---------------------------------------------------------------------------
# Kernel
# ---------------------------------------------------------------------------
def _self_attention_kernel(h_ref, wqkv_ref, bqkv_ref, mask_ref, *rest,
                           batch_block, seq_len, num_heads, head_dim,
                           hidden_size, mask_batch, mask_heads, out_scores):
    """Processes `batch_block` sequences per grid step (grid axis 0 = batch blocks).

    h_ref:     (Nb, L, D)          hidden states, bf16
    wqkv_ref:  (D, 3D)             fused [Wq | Wk | Wv] weights, bf16, (in, out) layout
    bqkv_ref:  (1, 3D)             fused bias, f32
    mask_ref:  (Nbm, Hm, Lq, L)    additive mask (Nbm in {1,Nb}, Hm in {1,H}, Lq in {1,L})
    rest:      ctx_ref (Nb, L, D) [, score_ref (Nb, H, L, L)], qkv_scr (3, Nb*L, D) bf16
    """
    if out_scores:
        ctx_ref, score_ref, qkv_scr = rest
    else:
        ctx_ref, qkv_scr = rest
        score_ref = None

    nb, L, D, dh = batch_block, seq_len, hidden_size, head_dim

    # ---- Fused QKV projection over all Nb*L rows: one MXU matmul with a filled
    # ---- M-dimension, f32 accumulation.
    x = h_ref[...].reshape(nb * L, D)                                    # bf16
    qkv = jnp.dot(x, wqkv_ref[...], preferred_element_type=jnp.float32)
    qkv = qkv + bqkv_ref[0]                                              # (Nb*L, 3D) f32

    # Stage bf16 Q/K/V in VMEM scratch (softmax scale folded into Q once) so the
    # big f32 qkv value dies here instead of staying live (as vregs/spills) across
    # the unrolled (Nb x H) attention loop below.
    scale = 1.0 / math.sqrt(dh)
    qkv_scr[0] = (qkv[:, :D] * scale).astype(jnp.bfloat16)
    qkv_scr[1] = qkv[:, D:2 * D].astype(jnp.bfloat16)
    qkv_scr[2] = qkv[:, 2 * D:].astype(jnp.bfloat16)

    for b in range(nb):                                                  # static loops
        bm = b if mask_batch > 1 else 0
        rows = slice(b * L, (b + 1) * L)

        if mask_heads == 1:
            # Hoist the mask load and its (1,L)->(L,L) broadcast out of the head
            # loop: JAX does not CSE broadcast_in_dim across unrolled iterations.
            m_all = jnp.broadcast_to(mask_ref[bm, 0], (L, L))

        for h in range(num_heads):
            cols = slice(h * dh, (h + 1) * dh)
            qh = qkv_scr[0, rows, cols]                                  # (L, dh) bf16
            kh = qkv_scr[1, rows, cols]
            vh = qkv_scr[2, rows, cols]

            # QK^T: contract on the head dim directly -> no in-kernel transpose.
            s = jax.lax.dot_general(
                qh, kh, dimension_numbers=(((1,), (1,)), ((), ())),
                preferred_element_type=jnp.float32)                      # (L, L) f32
            if mask_heads == 1:
                s = s + m_all
            else:
                s = s + mask_ref[bm, h]        # broadcasts over the q-dim if Lq == 1

            if out_scores:
                score_ref[b, h] = s

            # Numerically-stable softmax; reciprocal goes to the EUP slot.
            m = jnp.max(s, axis=-1, keepdims=True)
            e = jnp.exp(s - m)
            p = e * pl.reciprocal(jnp.sum(e, axis=-1, keepdims=True), approx=True)

            ctx_h = jnp.dot(p.astype(jnp.bfloat16), vh,
                            preferred_element_type=jnp.float32)          # (L, dh) f32
            # Direct per-head store into the output block: VMEM vst.msk only — the
            # HBM writeback is still one dense (Nb,L,D) DMA per grid step.
            # (On v5e's single vector-store slot a staged single dense store may be
            #  marginally better; kept simple and uniform here.)
            ctx_ref[b, :, cols] = ctx_h.astype(ctx_ref.dtype)


# ---------------------------------------------------------------------------
# Wrapper
# ---------------------------------------------------------------------------
def _vmem_limit_bytes():
    """Generation-aware scoped-VMEM limit: 3/4 of physical VMEM (v5e/v6e 128 MiB,
    v7x 64 MiB), leaving headroom for compiler-internal scratch."""
    try:
        cap = int(pltpu.get_tpu_info().vmem_capacity_bytes)
    except Exception:
        cap = 64 * 1024 * 1024
    return cap * 3 // 4


def _pick_batch_block(N, L, H, want_scores):
    """Sequences per grid step. Targets >= 256 rows for the fused QKV matmul so the
    MXU M-dimension is filled, caps the resident score block when scores are
    requested, and keeps >= 2 grid steps when possible so both v7x TensorCores get
    work on the parallel batch axis."""
    nb = max(1, min(N, pl.cdiv(256, L)))
    if want_scores:
        # Bound the double-buffered (Nb, H, L, L) f32 score block to ~8 MiB.
        nb = min(nb, max(1, (8 * 1024 * 1024) // (2 * H * L * L * 4)))
    while nb > 1 and pl.cdiv(N, nb) < 2:
        nb = pl.cdiv(nb, 2)
    return nb


def bert_self_attention(hidden_states, attention_mask,
                        wq, bq, wk, bk, wv, bv, *,
                        num_attention_heads, output_attentions=False):
    """Pallas-backed BertSelfAttention forward (eval mode).

    hidden_states:  (N, L, D) float32 (consumed in bf16 by the MXU matmuls)
    attention_mask: additive mask, shape (N or 1, H or 1, L or 1, L) float32
    w*: (D, D) in (in, out) layout (transposed vs. torch Linear.weight); b*: (D,)
    Returns (context_layer,) or (context_layer, attention_scores).
    NOTE: call under jit so the host-side weight fuse/cast happens once per compile.
    """
    N, L, D = hidden_states.shape
    H = num_attention_heads
    assert D % H == 0, "hidden size must be divisible by num heads"
    dh = D // H

    # Host-side fusion of the three projections; weights pre-cast to bf16
    # (1 weight DMA instead of 3, half the bytes).
    w_qkv = jnp.concatenate([wq, wk, wv], axis=1).astype(jnp.bfloat16)       # (D, 3D)
    b_qkv = jnp.concatenate([bq, bk, bv], axis=0).reshape(1, 3 * D).astype(jnp.float32)

    Nm, Hm, Lqm, Lkm = attention_mask.shape
    assert Lkm == L and Nm in (1, N) and Hm in (1, H) and Lqm in (1, L)
    mask = attention_mask.astype(jnp.float32)

    nb = _pick_batch_block(N, L, H, output_attentions)
    n_pad = pl.cdiv(N, nb) * nb
    grid = (n_pad // nb,)

    # The kernel consumes hidden states in bf16 anyway: pre-cast at the boundary so
    # the per-step activation DMA is half the bytes (matters most on v5e HBM BW).
    h = hidden_states.astype(jnp.bfloat16)
    if n_pad != N:
        h = jnp.pad(h, ((0, n_pad - N), (0, 0), (0, 0)))

    if Nm == N:
        if n_pad != N:
            mask = jnp.pad(mask, ((0, n_pad - N), (0, 0), (0, 0), (0, 0)))
        nbm = nb
        mask_idx = lambda g: (g, 0, 0, 0)
    else:
        nbm = 1
        mask_idx = lambda g: (0, 0, 0, 0)

    kernel = functools.partial(
        _self_attention_kernel,
        batch_block=nb, seq_len=L, num_heads=H, head_dim=dh, hidden_size=D,
        mask_batch=nbm, mask_heads=Hm, out_scores=output_attentions)

    out_specs = [pl.BlockSpec((nb, L, D), lambda g: (g, 0, 0))]
    out_shape = [jax.ShapeDtypeStruct((n_pad, L, D), jnp.float32)]
    if output_attentions:
        out_specs.append(pl.BlockSpec((nb, H, L, L), lambda g: (g, 0, 0, 0)))
        out_shape.append(jax.ShapeDtypeStruct((n_pad, H, L, L), jnp.float32))

    def build(single_buffer_weights):
        if single_buffer_weights:
            # Constant-index weight/bias blocks never need prefetch: one buffer.
            w_spec = pl.BlockSpec((D, 3 * D), lambda g: (0, 0),
                                  pipeline_mode=pl.Buffered(1))
            b_spec = pl.BlockSpec((1, 3 * D), lambda g: (0, 0),
                                  pipeline_mode=pl.Buffered(1))
        else:
            w_spec = pl.BlockSpec((D, 3 * D), lambda g: (0, 0))
            b_spec = pl.BlockSpec((1, 3 * D), lambda g: (0, 0))
        in_specs = [
            pl.BlockSpec((nb, L, D), lambda g: (g, 0, 0)),       # hidden states (bf16)
            w_spec,                                              # fused W_qkv (bf16)
            b_spec,                                              # fused bias (f32)
            pl.BlockSpec((nbm, Hm, Lqm, L), mask_idx),           # additive mask
        ]
        return pl.pallas_call(
            kernel,
            grid_spec=pltpu.PrefetchScalarGridSpec(
                num_scalar_prefetch=0,
                grid=grid,
                in_specs=in_specs,
                out_specs=out_specs,
                scratch_shapes=[pltpu.VMEM((3, nb * L, D), jnp.bfloat16)]),
            out_shape=out_shape,
            compiler_params=pltpu.CompilerParams(
                dimension_semantics=("parallel",),
                vmem_limit_bytes=_vmem_limit_bytes()),
        )

    # Prefer single-buffered constant weight blocks (saves one full weight copy of
    # VMEM, ~3.4 MiB at D=768); fall back to the default double-buffered pipeline
    # if this JAX build rejects pipeline_mode on pallas_call BlockSpecs.
    try:
        outs = build(True)(h, w_qkv, b_qkv, mask)
    except Exception:
        outs = build(False)(h, w_qkv, b_qkv, mask)

    if output_attentions:
        ctx, scores = outs
        if n_pad != N:
            ctx, scores = ctx[:N], scores[:N]
        return ctx, scores
    (ctx,) = outs
    if n_pad != N:
        ctx = ctx[:N]
    return (ctx,)


# ---------------------------------------------------------------------------
# Plain-JAX fp32 reference (mirrors the PyTorch module, eval mode)
# ---------------------------------------------------------------------------
def _reference(hidden_states, attention_mask, wq, bq, wk, bk, wv, bv, H):
    N, L, D = hidden_states.shape
    DH = D // H
    q = hidden_states @ wq + bq
    k = hidden_states @ wk + bk
    v = hidden_states @ wv + bv

    def split_heads(x):  # (N, L, D) -> (N, H, L, DH)
        return x.reshape(N, L, H, DH).transpose(0, 2, 1, 3)

    qh, kh, vh = split_heads(q), split_heads(k), split_heads(v)
    scores = jnp.einsum('nhqd,nhkd->nhqk', qh, kh) / math.sqrt(DH)
    scores = scores + attention_mask
    probs = jax.nn.softmax(scores, axis=-1)
    ctx = jnp.einsum('nhqk,nhkd->nhqd', probs, vh)
    ctx = ctx.transpose(0, 2, 1, 3).reshape(N, L, D)
    return ctx, scores


# ---------------------------------------------------------------------------
# Self-test
# ---------------------------------------------------------------------------
if __name__ == "__main__":
    ATOL = RTOL = 1e-2   # bf16 MXU inputs + approx reciprocal vs fp32 reference

    def make_inputs(key, N, L, D, H):
        ks = jax.random.split(key, 8)
        hidden = jax.random.normal(ks[0], (N, L, D), dtype=jnp.float32)
        wq = 0.02 * jax.random.normal(ks[1], (D, D), dtype=jnp.float32)
        wk = 0.02 * jax.random.normal(ks[2], (D, D), dtype=jnp.float32)
        wv = 0.02 * jax.random.normal(ks[3], (D, D), dtype=jnp.float32)
        bq = 0.02 * jax.random.normal(ks[4], (D,), dtype=jnp.float32)
        bk = 0.02 * jax.random.normal(ks[5], (D,), dtype=jnp.float32)
        bv = 0.02 * jax.random.normal(ks[6], (D,), dtype=jnp.float32)
        # BERT-style additive key mask: valid -> 0, padded -> -10000.
        lengths = jax.random.randint(ks[7], (N,), minval=max(1, L // 2), maxval=L + 1)
        key_valid = (jnp.arange(L)[None, :] < lengths[:, None]).astype(jnp.float32)
        compact = ((1.0 - key_valid)[:, None, None, :] * -10000.0).astype(jnp.float32)   # (N,1,1,L)
        full = jnp.broadcast_to(compact, (N, H, L, L)).astype(jnp.float32)                # (N,H,L,L)
        return hidden, (wq, bq, wk, bk, wv, bv), compact, full

    key_a, key_b = jax.random.split(jax.random.PRNGKey(0))

    # --- Config A: batch=2, seq=8, hidden=32, heads=4 ---
    N, L, D, H = 2, 8, 32, 4
    hidden, params, compact_mask, full_mask = make_inputs(key_a, N, L, D, H)
    wq, bq, wk, bk, wv, bv = params
    ctx_ref, scores_ref = _reference(hidden, full_mask, wq, bq, wk, bk, wv, bv, H)

    # 1) Full (N,H,L,L) mask + scores (output_attentions=True / graph_sprels case).
    ctx_f, scores_f = bert_self_attention(hidden, full_mask, wq, bq, wk, bk, wv, bv,
                                          num_attention_heads=H, output_attentions=True)
    # 2) Compact (N,1,1,L) mask (what CrossmodalEncoder's extend_neg_masks produces).
    ctx_c, scores_c = bert_self_attention(hidden, compact_mask, wq, bq, wk, bk, wv, bv,
                                          num_attention_heads=H, output_attentions=True)
    # 3) No scores output (LocalVPEncoder discards attention scores).
    (ctx_n,) = bert_self_attention(hidden, compact_mask, wq, bq, wk, bk, wv, bv,
                                   num_attention_heads=H, output_attentions=False)
    jax.block_until_ready((ctx_f, scores_f, ctx_c, scores_c, ctx_n))

    assert ctx_f.shape == (N, L, D) and scores_f.shape == (N, H, L, L)
    assert jnp.allclose(ctx_f, ctx_ref, atol=ATOL, rtol=RTOL)
    assert jnp.allclose(scores_f, scores_ref, atol=ATOL, rtol=RTOL)
    assert jnp.allclose(ctx_c, ctx_ref, atol=ATOL, rtol=RTOL)
    assert jnp.allclose(scores_c, scores_ref, atol=ATOL, rtol=RTOL)
    assert jnp.allclose(ctx_n, ctx_ref, atol=ATOL, rtol=RTOL)

    # --- Config B: batch=5 (odd) -> exercises Nb>1 sequence batching + padding ---
    N, L, D, H = 5, 8, 32, 4
    hidden, params, compact_mask, full_mask = make_inputs(key_b, N, L, D, H)
    wq, bq, wk, bk, wv, bv = params
    ctx_ref, scores_ref = _reference(hidden, full_mask, wq, bq, wk, bk, wv, bv, H)

    ctx_b, scores_b = bert_self_attention(hidden, full_mask, wq, bq, wk, bk, wv, bv,
                                          num_attention_heads=H, output_attentions=True)
    (ctx_b2,) = bert_self_attention(hidden, compact_mask, wq, bq, wk, bk, wv, bv,
                                    num_attention_heads=H, output_attentions=False)
    jax.block_until_ready((ctx_b, scores_b, ctx_b2))

    assert ctx_b.shape == (N, L, D) and scores_b.shape == (N, H, L, L)
    assert jnp.allclose(ctx_b, ctx_ref, atol=ATOL, rtol=RTOL)
    assert jnp.allclose(scores_b, scores_ref, atol=ATOL, rtol=RTOL)
    assert jnp.allclose(ctx_b2, ctx_ref, atol=ATOL, rtol=RTOL)

    print("KERNEL_OK")
</pallas_src>

<mosaic_0001>
module attributes {stable_mosaic.version = 11 : i64} {
  func.func @_self_attention_kernel(%arg0: i32, %arg1: memref<1x8x32xbf16, #tpu.memory_space<vmem>>, %arg2: memref<32x96xbf16, #tpu.memory_space<vmem>>, %arg3: memref<1x96xf32, #tpu.memory_space<vmem>>, %arg4: memref<1x4x8x8xf32, #tpu.memory_space<vmem>>, %arg5: memref<1x8x32xf32, #tpu.memory_space<vmem>>, %arg6: memref<1x4x8x8xf32, #tpu.memory_space<vmem>>, %arg7: memref<3x8x32xbf16, #tpu.memory_space<vmem>>) attributes {dimension_semantics = [#tpu.dimension_semantics<parallel>], iteration_bounds = array<i64: 2>, scalar_prefetch = 0 : i64, scratch_operands = 1 : i64, tpu.core_type = #tpu.core_type<tc>, window_params = [{transform_indices = @transform_0, window_bounds = array<i64: 1, 8, 32>}, {pipeline_mode = #tpu.pipeline_mode<synchronous>, transform_indices = @transform_1, window_bounds = array<i64: 32, 96>}, {pipeline_mode = #tpu.pipeline_mode<synchronous>, transform_indices = @transform_2, window_bounds = array<i64: 1, 96>}, {transform_indices = @transform_3, window_bounds = array<i64: 1, 4, 8, 8>}, {transform_indices = @transform_4, window_bounds = array<i64: 1, 8, 32>}, {transform_indices = @transform_5, window_bounds = array<i64: 1, 4, 8, 8>}]} {
    %c0 = arith.constant 0 : index
    %c0_0 = arith.constant 0 : index
    %c0_1 = arith.constant 0 : index
    %0 = vector.load %arg1[%c0, %c0_0, %c0_1] : memref<1x8x32xbf16, #tpu.memory_space<vmem>>, vector<1x8x32xbf16>
    %1 = vector.shape_cast %0 : vector<1x8x32xbf16> to vector<8x32xbf16>
    %c0_2 = arith.constant 0 : index
    %c0_3 = arith.constant 0 : index
    %2 = vector.load %arg2[%c0_2, %c0_3] : memref<32x96xbf16, #tpu.memory_space<vmem>>, vector<32x96xbf16>
    %cst = arith.constant dense<0.000000e+00> : vector<8x96xf32>
    %3 = tpu.matmul %1, %2, %cst {dimension_numbers = #tpu.dot_dimension_numbers<[1], [0], [0], [1], [0, 0, 1, 1], [], []>} : vector<8x32xbf16>, vector<32x96xbf16>, vector<8x96xf32> -> vector<8x96xf32>
    %c0_4 = arith.constant 0 : index
    %c0_5 = arith.constant 0 : index
    %4 = vector.load %arg3[%c0_4, %c0_5] : memref<1x96xf32, #tpu.memory_space<vmem>>, vector<1x96xf32>
    %5 = vector.shape_cast %4 : vector<1x96xf32> to vector<96xf32>
    %6 = vector.shape_cast %5 : vector<96xf32> to vector<1x96xf32>
    %7 = vector.broadcast %6 : vector<1x96xf32> to vector<8x96xf32>
    %8 = arith.addf %3, %7 : vector<8x96xf32>
    %9 = vector.extract_strided_slice %8 {offsets = [0, 0], sizes = [8, 32], strides = [1, 1]} : vector<8x96xf32> to vector<8x32xf32>
    %cst_6 = arith.constant 0.353553385 : f32
    %10 = vector.broadcast %cst_6 : f32 to vector<8x32xf32>
    %11 = arith.mulf %9, %10 : vector<8x32xf32>
    %12 = arith.truncf %11 : vector<8x32xf32> to vector<8x32xbf16>
    %c0_7 = arith.constant 0 : index
    %c0_8 = arith.constant 0 : index
    %c0_9 = arith.constant 0 : index
    %13 = vector.load %arg7[%c0_7, %c0_8, %c0_9] : memref<3x8x32xbf16, #tpu.memory_space<vmem>>, vector<1x8x32xbf16>
    %14 = vector.shape_cast %13 : vector<1x8x32xbf16> to vector<8x32xbf16>
    %15 = vector.shape_cast %12 : vector<8x32xbf16> to vector<1x8x32xbf16>
    tpu.vector_store %arg7[%c0_7, %c0_8, %c0_9], %15 {strides = array<i32>} : memref<3x8x32xbf16, #tpu.memory_space<vmem>>, vector<1x8x32xbf16>,
    %16 = vector.extract_strided_slice %8 {offsets = [0, 32], sizes = [8, 32], strides = [1, 1]} : vector<8x96xf32> to vector<8x32xf32>
    %17 = arith.truncf %16 : vector<8x32xf32> to vector<8x32xbf16>
    %c1 = arith.constant 1 : index
    %c0_10 = arith.constant 0 : index
    %c0_11 = arith.constant 0 : index
    %18 = vector.load %arg7[%c1, %c0_10, %c0_11] : memref<3x8x32xbf16, #tpu.memory_space<vmem>>, vector<1x8x32xbf16>
    %19 = vector.shape_cast %18 : vector<1x8x32xbf16> to vector<8x32xbf16>
    %20 = vector.shape_cast %17 : vector<8x32xbf16> to vector<1x8x32xbf16>
    tpu.vector_store %arg7[%c1, %c0_10, %c0_11], %20 {strides = array<i32>} : memref<3x8x32xbf16, #tpu.memory_space<vmem>>, vector<1x8x32xbf16>,
    %21 = vector.extract_strided_slice %8 {offsets = [0, 64], sizes = [8, 32], strides = [1, 1]} : vector<8x96xf32> to vector<8x32xf32>
    %22 = arith.truncf %21 : vector<8x32xf32> to vector<8x32xbf16>
    %c2 = arith.constant 2 : index
    %c0_12 = arith.constant 0 : index
    %c0_13 = arith.constant 0 : index
    %23 = vector.load %arg7[%c2, %c0_12, %c0_13] : memref<3x8x32xbf16, #tpu.memory_space<vmem>>, vector<1x8x32xbf16>
    %24 = vector.shape_cast %23 : vector<1x8x32xbf16> to vector<8x32xbf16>
    %25 = vector.shape_cast %22 : vector<8x32xbf16> to vector<1x8x32xbf16>
    tpu.vector_store %arg7[%c2, %c0_12, %c0_13], %25 {strides = array<i32>} : memref<3x8x32xbf16, #tpu.memory_space<vmem>>, vector<1x8x32xbf16>,
    %c0_14 = arith.constant 0 : index
    %c0_15 = arith.constant 0 : index
    %c0_16 = arith.constant 0 : index
    %26 = vector.load %arg7[%c0_14, %c0_15, %c0_16] : memref<3x8x32xbf16, #tpu.memory_space<vmem>>, vector<1x8x8xbf16>
    %27 = vector.shape_cast %26 : vector<1x8x8xbf16> to vector<8x8xbf16>
    %c1_17 = arith.constant 1 : index
    %c0_18 = arith.constant 0 : index
    %c0_19 = arith.constant 0 : index
    %28 = vector.load %arg7[%c1_17, %c0_18, %c0_19] : memref<3x8x32xbf16, #tpu.memory_space<vmem>>, vector<1x8x8xbf16>
    %29 = vector.shape_cast %28 : vector<1x8x8xbf16> to vector<8x8xbf16>
    %c2_20 = arith.constant 2 : index
    %c0_21 = arith.constant 0 : index
    %c0_22 = arith.constant 0 : index
    %30 = vector.load %arg7[%c2_20, %c0_21, %c0_22] : memref<3x8x32xbf16, #tpu.memory_space<vmem>>, vector<1x8x8xbf16>
    %31 = vector.shape_cast %30 : vector<1x8x8xbf16> to vector<8x8xbf16>
    %cst_23 = arith.constant dense<0.000000e+00> : vector<8x8xf32>
    %32 = tpu.matmul %27, %29, %cst_23 {dimension_numbers = #tpu.dot_dimension_numbers<[1], [1], [0], [0], [0, 0, 1, 0], [], []>} : vector<8x8xbf16>, vector<8x8xbf16>, vector<8x8xf32> -> vector<8x8xf32>
    %c0_24 = arith.constant 0 : index
    %c0_25 = arith.constant 0 : index
    %c0_26 = arith.constant 0 : index
    %c0_27 = arith.constant 0 : index
    %33 = vector.load %arg4[%c0_24, %c0_25, %c0_26, %c0_27] : memref<1x4x8x8xf32, #tpu.memory_space<vmem>>, vector<1x1x8x8xf32>
    %34 = vector.shape_cast %33 : vector<1x1x8x8xf32> to vector<8x8xf32>
    %35 = arith.addf %32, %34 : vector<8x8xf32>
    %c0_28 = arith.constant 0 : index
    %c0_29 = arith.constant 0 : index
    %c0_30 = arith.constant 0 : index
    %c0_31 = arith.constant 0 : index
    %36 = vector.load %arg6[%c0_28, %c0_29, %c0_30, %c0_31] : memref<1x4x8x8xf32, #tpu.memory_space<vmem>>, vector<1x1x8x8xf32>
    %37 = vector.shape_cast %36 : vector<1x1x8x8xf32> to vector<8x8xf32>
    %38 = vector.shape_cast %35 : vector<8x8xf32> to vector<1x1x8x8xf32>
    tpu.vector_store %arg6[%c0_28, %c0_29, %c0_30, %c0_31], %38 {strides = array<i32>} : memref<1x4x8x8xf32, #tpu.memory_space<vmem>>, vector<1x1x8x8xf32>,
    %cst_32 = arith.constant dense<0xFF800000> : vector<8xf32>
    %39 = vector.multi_reduction <maximumf>, %35, %cst_32 [1] : vector<8x8xf32> to vector<8xf32>
    %40 = vector.shape_cast %39 : vector<8xf32> to vector<8x1xf32>
    %41 = vector.broadcast %40 : vector<8x1xf32> to vector<8x8xf32>
    %42 = arith.subf %35, %41 : vector<8x8xf32>
    %43 = math.exp %42 : vector<8x8xf32>
    %cst_33 = arith.constant dense<0.000000e+00> : vector<8xf32>
    %44 = vector.multi_reduction <add>, %43, %cst_33 [1] : vector<8x8xf32> to vector<8xf32>
    %45 = vector.shape_cast %44 : vector<8xf32> to vector<8x1xf32>
    %46 = tpu.reciprocal %45 {approx = true} : vector<8x1xf32> -> vector<8x1xf32>
    %47 = vector.broadcast %46 : vector<8x1xf32> to vector<8x8xf32>
    %48 = arith.mulf %43, %47 : vector<8x8xf32>
    %49 = arith.truncf %48 : vector<8x8xf32> to vector<8x8xbf16>
    %cst_34 = arith.constant dense<0.000000e+00> : vector<8x8xf32>
    %50 = tpu.matmul %49, %31, %cst_34 {dimension_numbers = #tpu.dot_dimension_numbers<[1], [0], [0], [1], [0, 0, 1, 1], [], []>} : vector<8x8xbf16>, vector<8x8xbf16>, vector<8x8xf32> -> vector<8x8xf32>
    %c0_35 = arith.constant 0 : index
    %c0_36 = arith.constant 0 : index
    %c0_37 = arith.constant 0 : index
    %51 = vector.load %arg5[%c0_35, %c0_36, %c0_37] : memref<1x8x32xf32, #tpu.memory_space<vmem>>, vector<1x8x8xf32>
    %52 = vector.shape_cast %51 : vector<1x8x8xf32> to vector<8x8xf32>
    %53 = vector.shape_cast %50 : vector<8x8xf32> to vector<1x8x8xf32>
    tpu.vector_store %arg5[%c0_35, %c0_36, %c0_37], %53 {strides = array<i32>} : memref<1x8x32xf32, #tpu.memory_space<vmem>>, vector<1x8x8xf32>,
    %c0_38 = arith.constant 0 : index
    %c0_39 = arith.constant 0 : index
    %c8 = arith.constant 8 : index
    %54 = vector.load %arg7[%c0_38, %c0_39, %c8] : memref<3x8x32xbf16, #tpu.memory_space<vmem>>, vector<1x8x8xbf16>
    %55 = vector.shape_cast %54 : vector<1x8x8xbf16> to vector<8x8xbf16>
    %c1_40 = arith.constant 1 : index
    %c0_41 = arith.constant 0 : index
    %c8_42 = arith.constant 8 : index
    %56 = vector.load %arg7[%c1_40, %c0_41, %c8_42] : memref<3x8x32xbf16, #tpu.memory_space<vmem>>, vector<1x8x8xbf16>
    %57 = vector.shape_cast %56 : vector<1x8x8xbf16> to vector<8x8xbf16>
    %c2_43 = arith.constant 2 : index
    %c0_44 = arith.constant 0 : index
    %c8_45 = arith.constant 8 : index
    %58 = vector.load %arg7[%c2_43, %c0_44, %c8_45] : memref<3x8x32xbf16, #tpu.memory_space<vmem>>, vector<1x8x8xbf16>
    %59 = vector.shape_cast %58 : vector<1x8x8xbf16> to vector<8x8xbf16>
    %cst_46 = arith.constant dense<0.000000e+00> : vector<8x8xf32>
    %60 = tpu.matmul %55, %57, %cst_46 {dimension_numbers = #tpu.dot_dimension_numbers<[1], [1], [0], [0], [0, 0, 1, 0], [], []>} : vector<8x8xbf16>, vector<8x8xbf16>, vector<8x8xf32> -> vector<8x8xf32>
    %c0_47 = arith.constant 0 : index
    %c1_48 = arith.constant 1 : index
    %c0_49 = arith.constant 0 : index
    %c0_50 = arith.constant 0 : index
    %61 = vector.load %arg4[%c0_47, %c1_48, %c0_49, %c0_50] : memref<1x4x8x8xf32, #tpu.memory_space<vmem>>, vector<1x1x8x8xf32>
    %62 = vector.shape_cast %61 : vector<1x1x8x8xf32> to vector<8x8xf32>
    %63 = arith.addf %60, %62 : vector<8x8xf32>
    %c0_51 = arith.constant 0 : index
    %c1_52 = arith.constant 1 : index
    %c0_53 = arith.constant 0 : index
    %c0_54 = arith.constant 0 : index
    %64 = vector.load %arg6[%c0_51, %c1_52, %c0_53, %c0_54] : memref<1x4x8x8xf32, #tpu.memory_space<vmem>>, vector<1x1x8x8xf32>
    %65 = vector.shape_cast %64 : vector<1x1x8x8xf32> to vector<8x8xf32>
    %66 = vector.shape_cast %63 : vector<8x8xf32> to vector<1x1x8x8xf32>
    tpu.vector_store %arg6[%c0_51, %c1_52, %c0_53, %c0_54], %66 {strides = array<i32>} : memref<1x4x8x8xf32, #tpu.memory_space<vmem>>, vector<1x1x8x8xf32>,
    %cst_55 = arith.constant dense<0xFF800000> : vector<8xf32>
    %67 = vector.multi_reduction <maximumf>, %63, %cst_55 [1] : vector<8x8xf32> to vector<8xf32>
    %68 = vector.shape_cast %67 : vector<8xf32> to vector<8x1xf32>
    %69 = vector.broadcast %68 : vector<8x1xf32> to vector<8x8xf32>
    %70 = arith.subf %63, %69 : vector<8x8xf32>
    %71 = math.exp %70 : vector<8x8xf32>
    %cst_56 = arith.constant dense<0.000000e+00> : vector<8xf32>
    %72 = vector.multi_reduction <add>, %71, %cst_56 [1] : vector<8x8xf32> to vector<8xf32>
    %73 = vector.shape_cast %72 : vector<8xf32> to vector<8x1xf32>
    %74 = tpu.reciprocal %73 {approx = true} : vector<8x1xf32> -> vector<8x1xf32>
    %75 = vector.broadcast %74 : vector<8x1xf32> to vector<8x8xf32>
    %76 = arith.mulf %71, %75 : vector<8x8xf32>
    %77 = arith.truncf %76 : vector<8x8xf32> to vector<8x8xbf16>
    %cst_57 = arith.constant dense<0.000000e+00> : vector<8x8xf32>
    %78 = tpu.matmul %77, %59, %cst_57 {dimension_numbers = #tpu.dot_dimension_numbers<[1], [0], [0], [1], [0, 0, 1, 1], [], []>} : vector<8x8xbf16>, vector<8x8xbf16>, vector<8x8xf32> -> vector<8x8xf32>
    %c0_58 = arith.constant 0 : index
    %c0_59 = arith.constant 0 : index
    %c8_60 = arith.constant 8 : index
    %79 = vector.load %arg5[%c0_58, %c0_59, %c8_60] : memref<1x8x32xf32, #tpu.memory_space<vmem>>, vector<1x8x8xf32>
    %80 = vector.shape_cast %79 : vector<1x8x8xf32> to vector<8x8xf32>
    %81 = vector.shape_cast %78 : vector<8x8xf32> to vector<1x8x8xf32>
    tpu.vector_store %arg5[%c0_58, %c0_59, %c8_60], %81 {strides = array<i32>} : memref<1x8x32xf32, #tpu.memory_space<vmem>>, vector<1x8x8xf32>,
    %c0_61 = arith.constant 0 : index
    %c0_62 = arith.constant 0 : index
    %c16 = arith.constant 16 : index
    %82 = vector.load %arg7[%c0_61, %c0_62, %c16] : memref<3x8x32xbf16, #tpu.memory_space<vmem>>, vector<1x8x8xbf16>
    %83 = vector.shape_cast %82 : vector<1x8x8xbf16> to vector<8x8xbf16>
    %c1_63 = arith.constant 1 : index
    %c0_64 = arith.constant 0 : index
    %c16_65 = arith.constant 16 : index
    %84 = vector.load %arg7[%c1_63, %c0_64, %c16_65] : memref<3x8x32xbf16, #tpu.memory_space<vmem>>, vector<1x8x8xbf16>
    %85 = vector.shape_cast %84 : vector<1x8x8xbf16> to vector<8x8xbf16>
    %c2_66 = arith.constant 2 : index
    %c0_67 = arith.constant 0 : index
    %c16_68 = arith.constant 16 : index
    %86 = vector.load %arg7[%c2_66, %c0_67, %c16_68] : memref<3x8x32xbf16, #tpu.memory_space<vmem>>, vector<1x8x8xbf16>
    %87 = vector.shape_cast %86 : vector<1x8x8xbf16> to vector<8x8xbf16>
    %cst_69 = arith.constant dense<0.000000e+00> : vector<8x8xf32>
    %88 = tpu.matmul %83, %85, %cst_69 {dimension_numbers = #tpu.dot_dimension_numbers<[1], [1], [0], [0], [0, 0, 1, 0], [], []>} : vector<8x8xbf16>, vector<8x8xbf16>, vector<8x8xf32> -> vector<8x8xf32>
    %c0_70 = arith.constant 0 : index
    %c2_71 = arith.constant 2 : index
    %c0_72 = arith.constant 0 : index
    %c0_73 = arith.constant 0 : index
    %89 = vector.load %arg4[%c0_70, %c2_71, %c0_72, %c0_73] : memref<1x4x8x8xf32, #tpu.memory_space<vmem>>, vector<1x1x8x8xf32>
    %90 = vector.shape_cast %89 : vector<1x1x8x8xf32> to vector<8x8xf32>
    %91 = arith.addf %88, %90 : vector<8x8xf32>
    %c0_74 = arith.constant 0 : index
    %c2_75 = arith.constant 2 : index
    %c0_76 = arith.constant 0 : index
    %c0_77 = arith.constant 0 : index
    %92 = vector.load %arg6[%c0_74, %c2_75, %c0_76, %c0_77] : memref<1x4x8x8xf32, #tpu.memory_space<vmem>>, vector<1x1x8x8xf32>
    %93 = vector.shape_cast %92 : vector<1x1x8x8xf32> to vector<8x8xf32>
    %94 = vector.shape_cast %91 : vector<8x8xf32> to vector<1x1x8x8xf32>
    tpu.vector_store %arg6[%c0_74, %c2_75, %c0_76, %c0_77], %94 {strides = array<i32>} : memref<1x4x8x8xf32, #tpu.memory_space<vmem>>, vector<1x1x8x8xf32>,
    %cst_78 = arith.constant dense<0xFF800000> : vector<8xf32>
    %95 = vector.multi_reduction <maximumf>, %91, %cst_78 [1] : vector<8x8xf32> to vector<8xf32>
    %96 = vector.shape_cast %95 : vector<8xf32> to vector<8x1xf32>
    %97 = vector.broadcast %96 : vector<8x1xf32> to vector<8x8xf32>
    %98 = arith.subf %91, %97 : vector<8x8xf32>
    %99 = math.exp %98 : vector<8x8xf32>
    %cst_79 = arith.constant dense<0.000000e+00> : vector<8xf32>
    %100 = vector.multi_reduction <add>, %99, %cst_79 [1] : vector<8x8xf32> to vector<8xf32>
    %101 = vector.shape_cast %100 : vector<8xf32> to vector<8x1xf32>
    %102 = tpu.reciprocal %101 {approx = true} : vector<8x1xf32> -> vector<8x1xf32>
    %103 = vector.broadcast %102 : vector<8x1xf32> to vector<8x8xf32>
    %104 = arith.mulf %99, %103 : vector<8x8xf32>
    %105 = arith.truncf %104 : vector<8x8xf32> to vector<8x8xbf16>
    %cst_80 = arith.constant dense<0.000000e+00> : vector<8x8xf32>
    %106 = tpu.matmul %105, %87, %cst_80 {dimension_numbers = #tpu.dot_dimension_numbers<[1], [0], [0], [1], [0, 0, 1, 1], [], []>} : vector<8x8xbf16>, vector<8x8xbf16>, vector<8x8xf32> -> vector<8x8xf32>
    %c0_81 = arith.constant 0 : index
    %c0_82 = arith.constant 0 : index
    %c16_83 = arith.constant 16 : index
    %107 = vector.load %arg5[%c0_81, %c0_82, %c16_83] : memref<1x8x32xf32, #tpu.memory_space<vmem>>, vector<1x8x8xf32>
    %108 = vector.shape_cast %107 : vector<1x8x8xf32> to vector<8x8xf32>
    %109 = vector.shape_cast %106 : vector<8x8xf32> to vector<1x8x8xf32>
    tpu.vector_store %arg5[%c0_81, %c0_82, %c16_83], %109 {strides = array<i32>} : memref<1x8x32xf32, #tpu.memory_space<vmem>>, vector<1x8x8xf32>,
    %c0_84 = arith.constant 0 : index
    %c0_85 = arith.constant 0 : index
    %c24 = arith.constant 24 : index
    %110 = vector.load %arg7[%c0_84, %c0_85, %c24] : memref<3x8x32xbf16, #tpu.memory_space<vmem>>, vector<1x8x8xbf16>
    %111 = vector.shape_cast %110 : vector<1x8x8xbf16> to vector<8x8xbf16>
    %c1_86 = arith.constant 1 : index
    %c0_87 = arith.constant 0 : index
    %c24_88 = arith.constant 24 : index
    %112 = vector.load %arg7[%c1_86, %c0_87, %c24_88] : memref<3x8x32xbf16, #tpu.memory_space<vmem>>, vector<1x8x8xbf16>
    %113 = vector.shape_cast %112 : vector<1x8x8xbf16> to vector<8x8xbf16>
    %c2_89 = arith.constant 2 : index
    %c0_90 = arith.constant 0 : index
    %c24_91 = arith.constant 24 : index
    %114 = vector.load %arg7[%c2_89, %c0_90, %c24_91] : memref<3x8x32xbf16, #tpu.memory_space<vmem>>, vector<1x8x8xbf16>
    %115 = vector.shape_cast %114 : vector<1x8x8xbf16> to vector<8x8xbf16>
    %cst_92 = arith.constant dense<0.000000e+00> : vector<8x8xf32>
    %116 = tpu.matmul %111, %113, %cst_92 {dimension_numbers = #tpu.dot_dimension_numbers<[1], [1], [0], [0], [0, 0, 1, 0], [], []>} : vector<8x8xbf16>, vector<8x8xbf16>, vector<8x8xf32> -> vector<8x8xf32>
    %c0_93 = arith.constant 0 : index
    %c3 = arith.constant 3 : index
    %c0_94 = arith.constant 0 : index
    %c0_95 = arith.constant 0 : index
    %117 = vector.load %arg4[%c0_93, %c3, %c0_94, %c0_95] : memref<1x4x8x8xf32, #tpu.memory_space<vmem>>, vector<1x1x8x8xf32>
    %118 = vector.shape_cast %117 : vector<1x1x8x8xf32> to vector<8x8xf32>
    %119 = arith.addf %116, %118 : vector<8x8xf32>
    %c0_96 = arith.constant 0 : index
    %c3_97 = arith.constant 3 : index
    %c0_98 = arith.constant 0 : index
    %c0_99 = arith.constant 0 : index
    %120 = vector.load %arg6[%c0_96, %c3_97, %c0_98, %c0_99] : memref<1x4x8x8xf32, #tpu.memory_space<vmem>>, vector<1x1x8x8xf32>
    %121 = vector.shape_cast %120 : vector<1x1x8x8xf32> to vector<8x8xf32>
    %122 = vector.shape_cast %119 : vector<8x8xf32> to vector<1x1x8x8xf32>
    tpu.vector_store %arg6[%c0_96, %c3_97, %c0_98, %c0_99], %122 {strides = array<i32>} : memref<1x4x8x8xf32, #tpu.memory_space<vmem>>, vector<1x1x8x8xf32>,
    %cst_100 = arith.constant dense<0xFF800000> : vector<8xf32>
    %123 = vector.multi_reduction <maximumf>, %119, %cst_100 [1] : vector<8x8xf32> to vector<8xf32>
    %124 = vector.shape_cast %123 : vector<8xf32> to vector<8x1xf32>
    %125 = vector.broadcast %124 : vector<8x1xf32> to vector<8x8xf32>
    %126 = arith.subf %119, %125 : vector<8x8xf32>
    %127 = math.exp %126 : vector<8x8xf32>
    %cst_101 = arith.constant dense<0.000000e+00> : vector<8xf32>
    %128 = vector.multi_reduction <add>, %127, %cst_101 [1] : vector<8x8xf32> to vector<8xf32>
    %129 = vector.shape_cast %128 : vector<8xf32> to vector<8x1xf32>
    %130 = tpu.reciprocal %129 {approx = true} : vector<8x1xf32> -> vector<8x1xf32>
    %131 = vector.broadcast %130 : vector<8x1xf32> to vector<8x8xf32>
    %132 = arith.mulf %127, %131 : vector<8x8xf32>
    %133 = arith.truncf %132 : vector<8x8xf32> to vector<8x8xbf16>
    %cst_102 = arith.constant dense<0.000000e+00> : vector<8x8xf32>
    %134 = tpu.matmul %133, %115, %cst_102 {dimension_numbers = #tpu.dot_dimension_numbers<[1], [0], [0], [1], [0, 0, 1, 1], [], []>} : vector<8x8xbf16>, vector<8x8xbf16>, vector<8x8xf32> -> vector<8x8xf32>
    %c0_103 = arith.constant 0 : index
    %c0_104 = arith.constant 0 : index
    %c24_105 = arith.constant 24 : index
    %135 = vector.load %arg5[%c0_103, %c0_104, %c24_105] : memref<1x8x32xf32, #tpu.memory_space<vmem>>, vector<1x8x8xf32>
    %136 = vector.shape_cast %135 : vector<1x8x8xf32> to vector<8x8xf32>
    %137 = vector.shape_cast %134 : vector<8x8xf32> to vector<1x8x8xf32>
    tpu.vector_store %arg5[%c0_103, %c0_104, %c24_105], %137 {strides = array<i32>} : memref<1x8x32xf32, #tpu.memory_space<vmem>>, vector<1x8x8xf32>,
    return
  }
  func.func @transform_0(%arg0: i32) -> (i32, i32, i32) {
    %c0_i32 = arith.constant 0 : i32
    %c0_i32_0 = arith.constant 0 : i32
    %c0_i32_1 = arith.constant 0 : i32
    return %arg0, %c0_i32, %c0_i32_0 : i32, i32, i32
  }
  func.func @transform_1(%arg0: i32) -> (i32, i32) {
    %c0_i32 = arith.constant 0 : i32
    %c0_i32_0 = arith.constant 0 : i32
    %c0_i32_1 = arith.constant 0 : i32
    return %c0_i32, %c0_i32_0 : i32, i32
  }
  func.func @transform_2(%arg0: i32) -> (i32, i32) {
    %c0_i32 = arith.constant 0 : i32
    %c0_i32_0 = arith.constant 0 : i32
    %c0_i32_1 = arith.constant 0 : i32
    return %c0_i32, %c0_i32_0 : i32, i32
  }
  func.func @transform_3(%arg0: i32) -> (i32, i32, i32, i32) {
    %c0_i32 = arith.constant 0 : i32
    %c0_i32_0 = arith.constant 0 : i32
    %c0_i32_1 = arith.constant 0 : i32
    %c0_i32_2 = arith.constant 0 : i32
    return %arg0, %c0_i32, %c0_i32_0, %c0_i32_1 : i32, i32, i32, i32
  }
  func.func @transform_4(%arg0: i32) -> (i32, i32, i32) {
    %c0_i32 = arith.constant 0 : i32
    %c0_i32_0 = arith.constant 0 : i32
    %c0_i32_1 = arith.constant 0 : i32
    return %arg0, %c0_i32, %c0_i32_0 : i32, i32, i32
  }
  func.func @transform_5(%arg0: i32) -> (i32, i32, i32, i32) {
    %c0_i32 = arith.constant 0 : i32
    %c0_i32_0 = arith.constant 0 : i32
    %c0_i32_1 = arith.constant 0 : i32
    %c0_i32_2 = arith.constant 0 : i32
    return %arg0, %c0_i32, %c0_i32_0, %c0_i32_1 : i32, i32, i32, i32
  }
}

module attributes {stable_mosaic.version = 11 : i64} {
  func.func @_self_attention_kernel(%arg0: i32, %arg1: memref<1x8x32xbf16, #tpu.memory_space<vmem>>, %arg2: memref<32x96xbf16, #tpu.memory_space<vmem>>, %arg3: memref<1x96xf32, #tpu.memory_space<vmem>>, %arg4: memref<1x4x8x8xf32, #tpu.memory_space<vmem>>, %arg5: memref<1x8x32xf32, #tpu.memory_space<vmem>>, %arg6: memref<1x4x8x8xf32, #tpu.memory_space<vmem>>, %arg7: memref<3x8x32xbf16, #tpu.memory_space<vmem>>) attributes {dimension_semantics = [#tpu.dimension_semantics<parallel>], iteration_bounds = array<i64: 2>, scalar_prefetch = 0 : i64, scratch_operands = 1 : i64, tpu.core_type = #tpu.core_type<tc>, window_params = [{transform_indices = @transform_0, window_bounds = array<i64: 1, 8, 32>}, {pipeline_mode = #tpu.pipeline_mode<synchronous>, transform_indices = @transform_1, window_bounds = array<i64: 32, 96>}, {pipeline_mode = #tpu.pipeline_mode<synchronous>, transform_indices = @transform_2, window_bounds = array<i64: 1, 96>}, {transform_indices = @transform_3, window_bounds = array<i64: 1, 4, 8, 8>}, {transform_indices = @transform_4, window_bounds = array<i64: 1, 8, 32>}, {transform_indices = @transform_5, window_bounds = array<i64: 1, 4, 8, 8>}]} {
    %c0 = arith.constant 0 : index
    %c0_0 = arith.constant 0 : index
    %c0_1 = arith.constant 0 : index
    %0 = vector.load %arg1[%c0, %c0_0, %c0_1] : memref<1x8x32xbf16, #tpu.memory_space<vmem>>, vector<1x8x32xbf16>
    %1 = vector.shape_cast %0 : vector<1x8x32xbf16> to vector<8x32xbf16>
    %c0_2 = arith.constant 0 : index
    %c0_3 = arith.constant 0 : index
    %2 = vector.load %arg2[%c0_2, %c0_3] : memref<32x96xbf16, #tpu.memory_space<vmem>>, vector<32x96xbf16>
    %cst = arith.constant dense<0.000000e+00> : vector<8x96xf32>
    %3 = tpu.matmul %1, %2, %cst {dimension_numbers = #tpu.dot_dimension_numbers<[1], [0], [0], [1], [0, 0, 1, 1], [], []>} : vector<8x32xbf16>, vector<32x96xbf16>, vector<8x96xf32> -> vector<8x96xf32>
    %c0_4 = arith.constant 0 : index
    %c0_5 = arith.constant 0 : index
    %4 = vector.load %arg3[%c0_4, %c0_5] : memref<1x96xf32, #tpu.memory_space<vmem>>, vector<1x96xf32>
    %5 = vector.shape_cast %4 : vector<1x96xf32> to vector<96xf32>
    %6 = vector.shape_cast %5 : vector<96xf32> to vector<1x96xf32>
    %7 = vector.broadcast %6 : vector<1x96xf32> to vector<8x96xf32>
    %8 = arith.addf %3, %7 : vector<8x96xf32>
    %9 = vector.extract_strided_slice %8 {offsets = [0, 0], sizes = [8, 32], strides = [1, 1]} : vector<8x96xf32> to vector<8x32xf32>
    %cst_6 = arith.constant 0.353553385 : f32
    %10 = vector.broadcast %cst_6 : f32 to vector<8x32xf32>
    %11 = arith.mulf %9, %10 : vector<8x32xf32>
    %12 = arith.truncf %11 : vector<8x32xf32> to vector<8x32xbf16>
    %c0_7 = arith.constant 0 : index
    %c0_8 = arith.constant 0 : index
    %c0_9 = arith.constant 0 : index
    %13 = vector.load %arg7[%c0_7, %c0_8, %c0_9] : memref<3x8x32xbf16, #tpu.memory_space<vmem>>, vector<1x8x32xbf16>
    %14 = vector.shape_cast %13 : vector<1x8x32xbf16> to vector<8x32xbf16>
    %15 = vector.shape_cast %12 : vector<8x32xbf16> to vector<1x8x32xbf16>
    tpu.vector_store %arg7[%c0_7, %c0_8, %c0_9], %15 {strides = array<i32>} : memref<3x8x32xbf16, #tpu.memory_space<vmem>>, vector<1x8x32xbf16>,
    %16 = vector.extract_strided_slice %8 {offsets = [0, 32], sizes = [8, 32], strides = [1, 1]} : vector<8x96xf32> to vector<8x32xf32>
    %17 = arith.truncf %16 : vector<8x32xf32> to vector<8x32xbf16>
    %c1 = arith.constant 1 : index
    %c0_10 = arith.constant 0 : index
    %c0_11 = arith.constant 0 : index
    %18 = vector.load %arg7[%c1, %c0_10, %c0_11] : memref<3x8x32xbf16, #tpu.memory_space<vmem>>, vector<1x8x32xbf16>
    %19 = vector.shape_cast %18 : vector<1x8x32xbf16> to vector<8x32xbf16>
    %20 = vector.shape_cast %17 : vector<8x32xbf16> to vector<1x8x32xbf16>
    tpu.vector_store %arg7[%c1, %c0_10, %c0_11], %20 {strides = array<i32>} : memref<3x8x32xbf16, #tpu.memory_space<vmem>>, vector<1x8x32xbf16>,
    %21 = vector.extract_strided_slice %8 {offsets = [0, 64], sizes = [8, 32], strides = [1, 1]} : vector<8x96xf32> to vector<8x32xf32>
    %22 = arith.truncf %21 : vector<8x32xf32> to vector<8x32xbf16>
    %c2 = arith.constant 2 : index
    %c0_12 = arith.constant 0 : index
    %c0_13 = arith.constant 0 : index
    %23 = vector.load %arg7[%c2, %c0_12, %c0_13] : memref<3x8x32xbf16, #tpu.memory_space<vmem>>, vector<1x8x32xbf16>
    %24 = vector.shape_cast %23 : vector<1x8x32xbf16> to vector<8x32xbf16>
    %25 = vector.shape_cast %22 : vector<8x32xbf16> to vector<1x8x32xbf16>
    tpu.vector_store %arg7[%c2, %c0_12, %c0_13], %25 {strides = array<i32>} : memref<3x8x32xbf16, #tpu.memory_space<vmem>>, vector<1x8x32xbf16>,
    %c0_14 = arith.constant 0 : index
    %c0_15 = arith.constant 0 : index
    %c0_16 = arith.constant 0 : index
    %26 = vector.load %arg7[%c0_14, %c0_15, %c0_16] : memref<3x8x32xbf16, #tpu.memory_space<vmem>>, vector<1x8x8xbf16>
    %27 = vector.shape_cast %26 : vector<1x8x8xbf16> to vector<8x8xbf16>
    %c1_17 = arith.constant 1 : index
    %c0_18 = arith.constant 0 : index
    %c0_19 = arith.constant 0 : index
    %28 = vector.load %arg7[%c1_17, %c0_18, %c0_19] : memref<3x8x32xbf16, #tpu.memory_space<vmem>>, vector<1x8x8xbf16>
    %29 = vector.shape_cast %28 : vector<1x8x8xbf16> to vector<8x8xbf16>
    %c2_20 = arith.constant 2 : index
    %c0_21 = arith.constant 0 : index
    %c0_22 = arith.constant 0 : index
    %30 = vector.load %arg7[%c2_20, %c0_21, %c0_22] : memref<3x8x32xbf16, #tpu.memory_space<vmem>>, vector<1x8x8xbf16>
    %31 = vector.shape_cast %30 : vector<1x8x8xbf16> to vector<8x8xbf16>
    %cst_23 = arith.constant dense<0.000000e+00> : vector<8x8xf32>
    %32 = tpu.matmul %27, %29, %cst_23 {dimension_numbers = #tpu.dot_dimension_numbers<[1], [1], [0], [0], [0, 0, 1, 0], [], []>} : vector<8x8xbf16>, vector<8x8xbf16>, vector<8x8xf32> -> vector<8x8xf32>
    %c0_24 = arith.constant 0 : index
    %c0_25 = arith.constant 0 : index
    %c0_26 = arith.constant 0 : index
    %c0_27 = arith.constant 0 : index
    %33 = vector.load %arg4[%c0_24, %c0_25, %c0_26, %c0_27] : memref<1x4x8x8xf32, #tpu.memory_space<vmem>>, vector<1x1x8x8xf32>
    %34 = vector.shape_cast %33 : vector<1x1x8x8xf32> to vector<8x8xf32>
    %35 = arith.addf %32, %34 : vector<8x8xf32>
    %c0_28 = arith.constant 0 : index
    %c0_29 = arith.constant 0 : index
    %c0_30 = arith.constant 0 : index
    %c0_31 = arith.constant 0 : index
    %36 = vector.load %arg6[%c0_28, %c0_29, %c0_30, %c0_31] : memref<1x4x8x8xf32, #tpu.memory_space<vmem>>, vector<1x1x8x8xf32>
    %37 = vector.shape_cast %36 : vector<1x1x8x8xf32> to vector<8x8xf32>
    %38 = vector.shape_cast %35 : vector<8x8xf32> to vector<1x1x8x8xf32>
    tpu.vector_store %arg6[%c0_28, %c0_29, %c0_30, %c0_31], %38 {strides = array<i32>} : memref<1x4x8x8xf32, #tpu.memory_space<vmem>>, vector<1x1x8x8xf32>,
    %cst_32 = arith.constant dense<0xFF800000> : vector<8xf32>
    %39 = vector.multi_reduction <maximumf>, %35, %cst_32 [1] : vector<8x8xf32> to vector<8xf32>
    %40 = vector.shape_cast %39 : vector<8xf32> to vector<8x1xf32>
    %41 = vector.broadcast %40 : vector<8x1xf32> to vector<8x8xf32>
    %42 = arith.subf %35, %41 : vector<8x8xf32>
    %43 = math.exp %42 : vector<8x8xf32>
    %cst_33 = arith.constant dense<0.000000e+00> : vector<8xf32>
    %44 = vector.multi_reduction <add>, %43, %cst_33 [1] : vector<8x8xf32> to vector<8xf32>
    %45 = vector.shape_cast %44 : vector<8xf32> to vector<8x1xf32>
    %46 = tpu.reciprocal %45 {approx = true} : vector<8x1xf32> -> vector<8x1xf32>
    %47 = vector.broadcast %46 : vector<8x1xf32> to vector<8x8xf32>
    %48 = arith.mulf %43, %47 : vector<8x8xf32>
    %49 = arith.truncf %48 : vector<8x8xf32> to vector<8x8xbf16>
    %cst_34 = arith.constant dense<0.000000e+00> : vector<8x8xf32>
    %50 = tpu.matmul %49, %31, %cst_34 {dimension_numbers = #tpu.dot_dimension_numbers<[1], [0], [0], [1], [0, 0, 1, 1], [], []>} : vector<8x8xbf16>, vector<8x8xbf16>, vector<8x8xf32> -> vector<8x8xf32>
    %c0_35 = arith.constant 0 : index
    %c0_36 = arith.constant 0 : index
    %c0_37 = arith.constant 0 : index
    %51 = vector.load %arg5[%c0_35, %c0_36, %c0_37] : memref<1x8x32xf32, #tpu.memory_space<vmem>>, vector<1x8x8xf32>
    %52 = vector.shape_cast %51 : vector<1x8x8xf32> to vector<8x8xf32>
    %53 = vector.shape_cast %50 : vector<8x8xf32> to vector<1x8x8xf32>
    tpu.vector_store %arg5[%c0_35, %c0_36, %c0_37], %53 {strides = array<i32>} : memref<1x8x32xf32, #tpu.memory_space<vmem>>, vector<1x8x8xf32>,
    %c0_38 = arith.constant 0 : index
    %c0_39 = arith.constant 0 : index
    %c8 = arith.constant 8 : index
    %54 = vector.load %arg7[%c0_38, %c0_39, %c8] : memref<3x8x32xbf16, #tpu.memory_space<vmem>>, vector<1x8x8xbf16>
    %55 = vector.shape_cast %54 : vector<1x8x8xbf16> to vector<8x8xbf16>
    %c1_40 = arith.constant 1 : index
    %c0_41 = arith.constant 0 : index
    %c8_42 = arith.constant 8 : index
    %56 = vector.load %arg7[%c1_40, %c0_41, %c8_42] : memref<3x8x32xbf16, #tpu.memory_space<vmem>>, vector<1x8x8xbf16>
    %57 = vector.shape_cast %56 : vector<1x8x8xbf16> to vector<8x8xbf16>
    %c2_43 = arith.constant 2 : index
    %c0_44 = arith.constant 0 : index
    %c8_45 = arith.constant 8 : index
    %58 = vector.load %arg7[%c2_43, %c0_44, %c8_45] : memref<3x8x32xbf16, #tpu.memory_space<vmem>>, vector<1x8x8xbf16>
    %59 = vector.shape_cast %58 : vector<1x8x8xbf16> to vector<8x8xbf16>
    %cst_46 = arith.constant dense<0.000000e+00> : vector<8x8xf32>
    %60 = tpu.matmul %55, %57, %cst_46 {dimension_numbers = #tpu.dot_dimension_numbers<[1], [1], [0], [0], [0, 0, 1, 0], [], []>} : vector<8x8xbf16>, vector<8x8xbf16>, vector<8x8xf32> -> vector<8x8xf32>
    %c0_47 = arith.constant 0 : index
    %c1_48 = arith.constant 1 : index
    %c0_49 = arith.constant 0 : index
    %c0_50 = arith.constant 0 : index
    %61 = vector.load %arg4[%c0_47, %c1_48, %c0_49, %c0_50] : memref<1x4x8x8xf32, #tpu.memory_space<vmem>>, vector<1x1x8x8xf32>
    %62 = vector.shape_cast %61 : vector<1x1x8x8xf32> to vector<8x8xf32>
    %63 = arith.addf %60, %62 : vector<8x8xf32>
    %c0_51 = arith.constant 0 : index
    %c1_52 = arith.constant 1 : index
    %c0_53 = arith.constant 0 : index
    %c0_54 = arith.constant 0 : index
    %64 = vector.load %arg6[%c0_51, %c1_52, %c0_53, %c0_54] : memref<1x4x8x8xf32, #tpu.memory_space<vmem>>, vector<1x1x8x8xf32>
    %65 = vector.shape_cast %64 : vector<1x1x8x8xf32> to vector<8x8xf32>
    %66 = vector.shape_cast %63 : vector<8x8xf32> to vector<1x1x8x8xf32>
    tpu.vector_store %arg6[%c0_51, %c1_52, %c0_53, %c0_54], %66 {strides = array<i32>} : memref<1x4x8x8xf32, #tpu.memory_space<vmem>>, vector<1x1x8x8xf32>,
    %cst_55 = arith.constant dense<0xFF800000> : vector<8xf32>
    %67 = vector.multi_reduction <maximumf>, %63, %cst_55 [1] : vector<8x8xf32> to vector<8xf32>
    %68 = vector.shape_cast %67 : vector<8xf32> to vector<8x1xf32>
    %69 = vector.broadcast %68 : vector<8x1xf32> to vector<8x8xf32>
    %70 = arith.subf %63, %69 : vector<8x8xf32>
    %71 = math.exp %70 : vector<8x8xf32>
    %cst_56 = arith.constant dense<0.000000e+00> : vector<8xf32>
    %72 = vector.multi_reduction <add>, %71, %cst_56 [1] : vector<8x8xf32> to vector<8xf32>
    %73 = vector.shape_cast %72 : vector<8xf32> to vector<8x1xf32>
    %74 = tpu.reciprocal %73 {approx = true} : vector<8x1xf32> -> vector<8x1xf32>
    %75 = vector.broadcast %74 : vector<8x1xf32> to vector<8x8xf32>
    %76 = arith.mulf %71, %75 : vector<8x8xf32>
    %77 = arith.truncf %76 : vector<8x8xf32> to vector<8x8xbf16>
    %cst_57 = arith.constant dense<0.000000e+00> : vector<8x8xf32>
    %78 = tpu.matmul %77, %59, %cst_57 {dimension_numbers = #tpu.dot_dimension_numbers<[1], [0], [0], [1], [0, 0, 1, 1], [], []>} : vector<8x8xbf16>, vector<8x8xbf16>, vector<8x8xf32> -> vector<8x8xf32>
    %c0_58 = arith.constant 0 : index
    %c0_59 = arith.constant 0 : index
    %c8_60 = arith.constant 8 : index
    %79 = vector.load %arg5[%c0_58, %c0_59, %c8_60] : memref<1x8x32xf32, #tpu.memory_space<vmem>>, vector<1x8x8xf32>
    %80 = vector.shape_cast %79 : vector<1x8x8xf32> to vector<8x8xf32>
    %81 = vector.shape_cast %78 : vector<8x8xf32> to vector<1x8x8xf32>
    tpu.vector_store %arg5[%c0_58, %c0_59, %c8_60], %81 {strides = array<i32>} : memref<1x8x32xf32, #tpu.memory_space<vmem>>, vector<1x8x8xf32>,
    %c0_61 = arith.constant 0 : index
    %c0_62 = arith.constant 0 : index
    %c16 = arith.constant 16 : index
    %82 = vector.load %arg7[%c0_61, %c0_62, %c16] : memref<3x8x32xbf16, #tpu.memory_space<vmem>>, vector<1x8x8xbf16>
    %83 = vector.shape_cast %82 : vector<1x8x8xbf16> to vector<8x8xbf16>
    %c1_63 = arith.constant 1 : index
    %c0_64 = arith.constant 0 : index
    %c16_65 = arith.constant 16 : index
    %84 = vector.load %arg7[%c1_63, %c0_64, %c16_65] : memref<3x8x32xbf16, #tpu.memory_space<vmem>>, vector<1x8x8xbf16>
    %85 = vector.shape_cast %84 : vector<1x8x8xbf16> to vector<8x8xbf16>
    %c2_66 = arith.constant 2 : index
    %c0_67 = arith.constant 0 : index
    %c16_68 = arith.constant 16 : index
    %86 = vector.load %arg7[%c2_66, %c0_67, %c16_68] : memref<3x8x32xbf16, #tpu.memory_space<vmem>>, vector<1x8x8xbf16>
    %87 = vector.shape_cast %86 : vector<1x8x8xbf16> to vector<8x8xbf16>
    %cst_69 = arith.constant dense<0.000000e+00> : vector<8x8xf32>
    %88 = tpu.matmul %83, %85, %cst_69 {dimension_numbers = #tpu.dot_dimension_numbers<[1], [1], [0], [0], [0, 0, 1, 0], [], []>} : vector<8x8xbf16>, vector<8x8xbf16>, vector<8x8xf32> -> vector<8x8xf32>
    %c0_70 = arith.constant 0 : index
    %c2_71 = arith.constant 2 : index
    %c0_72 = arith.constant 0 : index
    %c0_73 = arith.constant 0 : index
    %89 = vector.load %arg4[%c0_70, %c2_71, %c0_72, %c0_73] : memref<1x4x8x8xf32, #tpu.memory_space<vmem>>, vector<1x1x8x8xf32>
    %90 = vector.shape_cast %89 : vector<1x1x8x8xf32> to vector<8x8xf32>
    %91 = arith.addf %88, %90 : vector<8x8xf32>
    %c0_74 = arith.constant 0 : index
    %c2_75 = arith.constant 2 : index
    %c0_76 = arith.constant 0 : index
    %c0_77 = arith.constant 0 : index
    %92 = vector.load %arg6[%c0_74, %c2_75, %c0_76, %c0_77] : memref<1x4x8x8xf32, #tpu.memory_space<vmem>>, vector<1x1x8x8xf32>
    %93 = vector.shape_cast %92 : vector<1x1x8x8xf32> to vector<8x8xf32>
    %94 = vector.shape_cast %91 : vector<8x8xf32> to vector<1x1x8x8xf32>
    tpu.vector_store %arg6[%c0_74, %c2_75, %c0_76, %c0_77], %94 {strides = array<i32>} : memref<1x4x8x8xf32, #tpu.memory_space<vmem>>, vector<1x1x8x8xf32>,
    %cst_78 = arith.constant dense<0xFF800000> : vector<8xf32>
    %95 = vector.multi_reduction <maximumf>, %91, %cst_78 [1] : vector<8x8xf32> to vector<8xf32>
    %96 = vector.shape_cast %95 : vector<8xf32> to vector<8x1xf32>
    %97 = vector.broadcast %96 : vector<8x1xf32> to vector<8x8xf32>
    %98 = arith.subf %91, %97 : vector<8x8xf32>
    %99 = math.exp %98 : vector<8x8xf32>
    %cst_79 = arith.constant dense<0.000000e+00> : vector<8xf32>
    %100 = vector.multi_reduction <add>, %99, %cst_79 [1] : vector<8x8xf32> to vector<8xf32>
    %101 = vector.shape_cast %100 : vector<8xf32> to vector<8x1xf32>
    %102 = tpu.reciprocal %101 {approx = true} : vector<8x1xf32> -> vector<8x1xf32>
    %103 = vector.broadcast %102 : vector<8x1xf32> to vector<8x8xf32>
    %104 = arith.mulf %99, %103 : vector<8x8xf32>
    %105 = arith.truncf %104 : vector<8x8xf32> to vector<8x8xbf16>
    %cst_80 = arith.constant dense<0.000000e+00> : vector<8x8xf32>
    %106 = tpu.matmul %105, %87, %cst_80 {dimension_numbers = #tpu.dot_dimension_numbers<[1], [0], [0], [1], [0, 0, 1, 1], [], []>} : vector<8x8xbf16>, vector<8x8xbf16>, vector<8x8xf32> -> vector<8x8xf32>
    %c0_81 = arith.constant 0 : index
    %c0_82 = arith.constant 0 : index
    %c16_83 = arith.constant 16 : index
    %107 = vector.load %arg5[%c0_81, %c0_82, %c16_83] : memref<1x8x32xf32, #tpu.memory_space<vmem>>, vector<1x8x8xf32>
    %108 = vector.shape_cast %107 : vector<1x8x8xf32> to vector<8x8xf32>
    %109 = vector.shape_cast %106 : vector<8x8xf32> to vector<1x8x8xf32>
    tpu.vector_store %arg5[%c0_81, %c0_82, %c16_83], %109 {strides = array<i32>} : memref<1x8x32xf32, #tpu.memory_space<vmem>>, vector<1x8x8xf32>,
    %c0_84 = arith.constant 0 : index
    %c0_85 = arith.constant 0 : index
    %c24 = arith.constant 24 : index
    %110 = vector.load %arg7[%c0_84, %c0_85, %c24] : memref<3x8x32xbf16, #tpu.memory_space<vmem>>, vector<1x8x8xbf16>
    %111 = vector.shape_cast %110 : vector<1x8x8xbf16> to vector<8x8xbf16>
    %c1_86 = arith.constant 1 : index
    %c0_87 = arith.constant 0 : index
    %c24_88 = arith.constant 24 : index
    %112 = vector.load %arg7[%c1_86, %c0_87, %c24_88] : memref<3x8x32xbf16, #tpu.memory_space<vmem>>, vector<1x8x8xbf16>
    %113 = vector.shape_cast %112 : vector<1x8x8xbf16> to vector<8x8xbf16>
    %c2_89 = arith.constant 2 : index
    %c0_90 = arith.constant 0 : index
    %c24_91 = arith.constant 24 : index
    %114 = vector.load %arg7[%c2_89, %c0_90, %c24_91] : memref<3x8x32xbf16, #tpu.memory_space<vmem>>, vector<1x8x8xbf16>
    %115 = vector.shape_cast %114 : vector<1x8x8xbf16> to vector<8x8xbf16>
    %cst_92 = arith.constant dense<0.000000e+00> : vector<8x8xf32>
    %116 = tpu.matmul %111, %113, %cst_92 {dimension_numbers = #tpu.dot_dimension_numbers<[1], [1], [0], [0], [0, 0, 1, 0], [], []>} : vector<8x8xbf16>, vector<8x8xbf16>, vector<8x8xf32> -> vector<8x8xf32>
    %c0_93 = arith.constant 0 : index
    %c3 = arith.constant 3 : index
    %c0_94 = arith.constant 0 : index
    %c0_95 = arith.constant 0 : index
    %117 = vector.load %arg4[%c0_93, %c3, %c0_94, %c0_95] : memref<1x4x8x8xf32, #tpu.memory_space<vmem>>, vector<1x1x8x8xf32>
    %118 = vector.shape_cast %117 : vector<1x1x8x8xf32> to vector<8x8xf32>
    %119 = arith.addf %116, %118 : vector<8x8xf32>
    %c0_96 = arith.constant 0 : index
    %c3_97 = arith.constant 3 : index
    %c0_98 = arith.constant 0 : index
    %c0_99 = arith.constant 0 : index
    %120 = vector.load %arg6[%c0_96, %c3_97, %c0_98, %c0_99] : memref<1x4x8x8xf32, #tpu.memory_space<vmem>>, vector<1x1x8x8xf32>
    %121 = vector.shape_cast %120 : vector<1x1x8x8xf32> to vector<8x8xf32>
    %122 = vector.shape_cast %119 : vector<8x8xf32> to vector<1x1x8x8xf32>
    tpu.vector_store %arg6[%c0_96, %c3_97, %c0_98, %c0_99], %122 {strides = array<i32>} : memref<1x4x8x8xf32, #tpu.memory_space<vmem>>, vector<1x1x8x8xf32>,
    %cst_100 = arith.constant dense<0xFF800000> : vector<8xf32>
    %123 = vector.multi_reduction <maximumf>, %119, %cst_100 [1] : vector<8x8xf32> to vector<8xf32>
    %124 = vector.shape_cast %123 : vector<8xf32> to vector<8x1xf32>
    %125 = vector.broadcast %124 : vector<8x1xf32> to vector<8x8xf32>
    %126 = arith.subf %119, %125 : vector<8x8xf32>
    %127 = math.exp %126 : vector<8x8xf32>
    %cst_101 = arith.constant dense<0.000000e+00> : vector<8xf32>
    %128 = vector.multi_reduction <add>, %127, %cst_101 [1] : vector<8x8xf32> to vector<8xf32>
    %129 = vector.shape_cast %128 : vector<8xf32> to vector<8x1xf32>
    %130 = tpu.reciprocal %129 {approx = true} : vector<8x1xf32> -> vector<8x1xf32>
    %131 = vector.broadcast %130 : vector<8x1xf32> to vector<8x8xf32>
    %132 = arith.mulf %127, %131 : vector<8x8xf32>
    %133 = arith.truncf %132 : vector<8x8xf32> to vector<8x8xbf16>
    %cst_102 = arith.constant dense<0.000000e+00> : vector<8x8xf32>
    %134 = tpu.matmul %133, %115, %cst_102 {dimension_numbers = #tpu.dot_dimension_numbers<[1], [0], [0], [1], [0, 0, 1, 1], [], []>} : vector<8x8xbf16>, vector<8x8xbf16>, vector<8x8xf32> -> vector<8x8xf32>
    %c0_103 = arith.constant 0 : index
    %c0_104 = arith.constant 0 : index
    %c24_105 = arith.constant 24 : index
    %135 = vector.load %arg5[%c0_103, %c0_104, %c24_105] : memref<1x8x32xf32, #tpu.memory_space<vmem>>, vector<1x8x8xf32>
    %136 = vector.shape_cast %135 : vector<1x8x8xf32> to vector<8x8xf32>
    %137 = vector.shape_cast %134 : vector<8x8xf32> to vector<1x8x8xf32>
    tpu.vector_store %arg5[%c0_103, %c0_104, %c24_105], %137 {strides = array<i32>} : memref<1x8x32xf32, #tpu.memory_space<vmem>>, vector<1x8x8xf32>,
    return
  }
  func.func @transform_0(%arg0: i32) -> (i32, i32, i32) {
    %c0_i32 = arith.constant 0 : i32
    %c0_i32_0 = arith.constant 0 : i32
    %c0_i32_1 = arith.constant 0 : i32
    return %arg0, %c0_i32, %c0_i32_0 : i32, i32, i32
  }
  func.func @transform_1(%arg0: i32) -> (i32, i32) {
    %c0_i32 = arith.constant 0 : i32
    %c0_i32_0 = arith.constant 0 : i32
    %c0_i32_1 = arith.constant 0 : i32
    return %c0_i32, %c0_i32_0 : i32, i32
  }
  func.func @transform_2(%arg0: i32) -> (i32, i32) {
    %c0_i32 = arith.constant 0 : i32
    %c0_i32_0 = arith.constant 0 : i32
    %c0_i32_1 = arith.constant 0 : i32
    return %c0_i32, %c0_i32_0 : i32, i32
  }
  func.func @transform_3(%arg0: i32) -> (i32, i32, i32, i32) {
    %c0_i32 = arith.constant 0 : i32
    %c0_i32_0 = arith.constant 0 : i32
    %c0_i32_1 = arith.constant 0 : i32
    %c0_i32_2 = arith.constant 0 : i32
    return %arg0, %c0_i32, %c0_i32_0, %c0_i32_1 : i32, i32, i32, i32
  }
  func.func @transform_4(%arg0: i32) -> (i32, i32, i32) {
    %c0_i32 = arith.constant 0 : i32
    %c0_i32_0 = arith.constant 0 : i32
    %c0_i32_1 = arith.constant 0 : i32
    return %arg0, %c0_i32, %c0_i32_0 : i32, i32, i32
  }
  func.func @transform_5(%arg0: i32) -> (i32, i32, i32, i32) {
    %c0_i32 = arith.constant 0 : i32
    %c0_i32_0 = arith.constant 0 : i32
    %c0_i32_1 = arith.constant 0 : i32
    %c0_i32_2 = arith.constant 0 : i32
    return %arg0, %c0_i32, %c0_i32_0, %c0_i32_1 : i32, i32, i32, i32
  }
}

</mosaic_0001>

<bundles_post_ra>
// kernel: tpu_custom_call.1
= control target key start
LH: loop header
LB: loop body
LE: loop exit
PB: predicated region body
PF: predicated region fallthrough
CT: control target
= control target key end

     0   :  { %11 = vsyncpa [#allocation4], 0  ;;  %s1889_s0 = inlined_call_operand.hbm [shape: bf16[2,8,32], index: 0, kind: input, shape index: {}]   ;;  %s1890_s1 = inlined_call_operand.hbm [shape: bf16[32,96], index: 1, kind: input, shape index: {}]   ;;  %s1891_s2 = inlined_call_operand.vmem [shape: f32[1,96], index: 2, kind: input, shape index: {}]   ;;  %s1892_s3 = inlined_call_operand.hbm [shape: f32[2,4,8,8], index: 3, kind: input, shape index: {}]   ;;  %s1893_s4 = inlined_call_operand.hbm [shape: f32[2,8,32], index: 4, kind: output, shape index: {0}]   ;;  %s1894_s5 = inlined_call_operand.hbm [shape: f32[2,4,8,8], index: 5, kind: output, shape index: {1}]  }
   0x1   :  { %13 = vsyncpa [#allocation4 + $0x1], 0 }
   0x2   :  { %14 = vsyncpa [#allocation7], 0 }
   0x3   :  { %15 = vsyncpa [#allocation5], 0 }
   0x4   :  { %17 = vsyncpa [#allocation5 + $0x1], 0 }
   0x5   :  { %18 = vsyncpa [#allocation11], 0 }
   0x6   :  { %20 = vsyncpa [#allocation11 + $0x1], 0  ;;  %s1538_s18 = smov 0   ;;  %s1540_s19 = smov 0  }
   0x7   :  { %s1542_s20 = smov 0   ;;  %s1544_s21 = smov 0  }
   0x8 LB: > { %s1559_s22 = sadd.s32 1, %s1486_s21   ;;  %s33_s23 = sadd.s32 1, %s1482_s20  ;;  %s1486_s21 = sphi %s1544_s21, %s1917_s21   ;;  %s1482_s20 = sphi %s1542_s20, %s1916_s20   ;;  %s1478_s19 = sphi %s1540_s19, %s1915_s19   ;;  %s1474_s18 = sphi %s1538_s18, %s1914_s18  }
   0x9   : > { %s30_s24 = ssub.s32 %s1486_s21, %s1559_s22  ;;  %p1895_p0 = scmp.ne.s32.totalorder %s1482_s20, %s1478_s19 }
   0xa   : > { %p31_p1 = scmp.eq.s32.totalorder %s30_s24, 0  ;;  %p41_p2 = scmp.eq.s32.totalorder %s1486_s21, 0 }
   0xb   : > { %p1224_p4 = scmp.lt.s32.totalorder %s1486_s21, 2  ;;  %s206_s26 = sand.u32 1, %s1486_s21  }
   0xc   : > { %s1570_s25 = scalar_select %p31_p1, %s1482_s20, %s33_s23  }
   0xd   : > { %p42_p5 = por %p41_p2, %p1895_p0  ;;  %s208_s27 = sand.u32 1, %s1482_s20  }
   0xe   : > { %s1069_s28 = sshll.u32 %s208_s27, 2  ;;  %s1070_s29 = sshll.u32 %s1486_s21, 6 }
   0xf   : > { %s1581_s7 = scalar_lea.hbm %s1889_s0, %s1070_s29  ;;  %s210_s8 = scalar_lea.vmem [#allocation3], %s1069_s28 }
  0x10   : > { %s217_s9 = sshll.u32 %s210_s8, 4  ;;  %p1583_p6 = pnand %p1224_p4, %p42_p5  ;;  %s218_s9 = int_to_ptr.vmem [resolvable:$true] %s217_s9 }
  0x11   : > { %s1071_s11 = sshll.u32 %s208_s27, 5  ;;  %s1587_s12 = scalar_lea.sflag [#allocation4], %s206_s26 }
  0x12   : > { %s1302_s13 = scalar_lea.hbm %s1581_s7, 64  ;;  %p1304_p8 = pneg %p1583_p6 }
  0x13   : > { %p1303_p7 = scmp.ne.s32.totalorder %s1581_s7, %s1302_s13  ;;  %s1307_s16 = scalar_lea.hbm %s1889_s0, 128 }
  0x14   : > { %p1308_p11 = scmp.lt.s32.totalorder %s1581_s7, %s1889_s0  ;;  %p1309_p12 = scmp.lt.s32.totalorder %s1307_s16, %s1302_s13 }
  0x15   : > { %p1305_p9 = pnand %p1304_p8, %p1303_p7 }
  0x16   : > { %p1310_p13 = por %p1309_p12, %p1308_p11 }
  0x17   : > { %p1306_p10 = pneg %p1305_p9 }
  0x19   : > { %p1311_p1 = pnand %p1310_p13, %p1306_p10 }
  0x1b   : > { %1314 = shalt.err (!%p1311_p1)
}
  0x1c   : > { %s1315_s24 = scalar_lea.vmem %s218_s9, 64  ;;  %s1488_s26 = smov [#allocation3]  }
  0x1d   : > { %p1316_p2 = scmp.ne.s32.totalorder %s218_s9, %s1315_s24  ;;  %s1320_s27 = sshll.u32 %s1488_s26, 4  ;;  %s1321_s27 = int_to_ptr.vmem [resolvable:$false] %s1320_s27 }
  0x1e   : > { %s1322_s28 = scalar_lea.vmem %s1321_s27, 128  ;;  %p1323_p7 = scmp.lt.s32.totalorder %s218_s9, %s1321_s27 }
  0x1f   : > { %p1318_p4 = pnand %p1316_p2, %p1304_p8  ;;  %p1324_p9 = scmp.lt.s32.totalorder %s1322_s28, %s1315_s24 }
  0x21   : > { %p1319_p5 = pneg %p1318_p4  ;;  %p1325_p3 = por %p1324_p9, %p1323_p7 }
  0x23   : > { %p1326_p0 = pnand %p1325_p3, %p1319_p5 }
  0x25   : > { %1329 = shalt.err (!%p1326_p0)
}
  0x26   : > { %1212 = dma.hbm_to_vmem [thread:$0]  (!%p1583_p6), %s1581_s7, 64, %s218_s9, %s1587_s12  }
  0x27   : > { %s228_s29 = scalar_lea.vmem [#allocation8], %s1071_s11  ;;  %s1613_s6 = sadd.s32 4294967295, %s1486_s21  }
  0x28   : > { %s235_s30 = sshll.u32 %s228_s29, 4  ;;  %s1065_s8 = sadd.s32 4294967294, %s1486_s21   ;;  %s1610_s30 = int_to_ptr.vmem [resolvable:$true] %s235_s30 }
  0x29   : > { %p46_p0 = scmp.ne.s32.totalorder %s1478_s19, %s1474_s18  ;;  %p1896_p3 = scmp.eq.s32.totalorder %s1613_s6, 0 }
  0x2a   : > { %p138_p10 = scmp.eq.s32.totalorder %s1613_s6, 1  ;;  %p144_p11 = scmp.eq.s32.totalorder %s1065_s8, 1 }
  0x2b   : > { %p1622_p12 = por %p1896_p3, %p46_p0  ;;  %p1066_p13 = scmp.ge.s32.totalorder %s1486_s21, 1 }
  0x2c   : > { %p1902_p1 = scmp.ne.s32.totalorder %s1482_s20, %s1478_s19  ;;  %p1634_p4 = por %p144_p11, %p46_p0 }
  0x2d   : > { %s1901_s7 = scalar_select %p1622_p12, 1, 0 }
  0x2e   : > { %p1630_p2 = por %p138_p10, %p1902_p1  ;;  %p177_p5 = scmp.lt.s32.totalorder %s1486_s21, 3 }
  0x2f   : > { %s1904_s11 = scalar_select %p1634_p4, 1, 0 }
  0x30   : > { %s1903_s9 = scalar_select %p1630_p2, 1, 0 }
  0x31   : > { %p1639_p7 = pnand %p1066_p13, %p177_p5  ;;  %s1489_s14 = smov [#allocation6]  }
  0x32   : > { %s189_s15 = sshll.u32 %s1489_s14, 4  ;;  %s1115_s16 = sshll.u32 %s1486_s21, 9  ;;  %s1643_s15 = int_to_ptr.vmem [resolvable:$true] %s189_s15 }
  0x33   : > { %s1905_s13 = scalar_select %p1639_p7, 1, 0 }
  0x34   : > { %p1205_p9 = pneg %p1639_p7  ;;  %s1651_s24 = scalar_lea.hbm %s1892_s3, %s1115_s16 }
  0x35   : > { %s1330_s27 = scalar_lea.hbm %s1651_s24, 512  ;;  %s1335_s8 = scalar_lea.hbm %s1892_s3, 1024 }
  0x36   : > { %p1655_p0 = pnand %p1205_p9, %p1896_p3  ;;  %p1331_p10 = scmp.ne.s32.totalorder %s1651_s24, %s1330_s27 }
  0x37   : > { %p1336_p1 = scmp.lt.s32.totalorder %s1651_s24, %s1892_s3  ;;  %p1337_p5 = scmp.lt.s32.totalorder %s1335_s8, %s1330_s27 }
  0x38   : > { %p1333_p11 = pnand %p1331_p10, %p1304_p8 }
  0x39   : > { %p1338_p4 = por %p1337_p5, %p1336_p1 }
  0x3a   : > { %p1334_p13 = pneg %p1333_p11 }
  0x3c   : > { %p1339_p9 = pnand %p1338_p4, %p1334_p13 }
  0x3e   : > { %1342 = shalt.err (!%p1339_p9)
}
  0x3f   : > { %s1343_s17 = scalar_lea.vmem %s1610_s30, 512  ;;  %s1490_s23 = smov [#allocation8]  }
  0x40   : > { %p1344_p3 = scmp.ne.s32.totalorder %s1610_s30, %s1343_s17  ;;  %s1348_s28 = sshll.u32 %s1490_s23, 4  ;;  %s1349_s28 = int_to_ptr.vmem [resolvable:$false] %s1348_s28 }
  0x41   : > { %s1350_s29 = scalar_lea.vmem %s1349_s28, 1024  ;;  %p1351_p2 = scmp.lt.s32.totalorder %s1610_s30, %s1349_s28 }
  0x42   : > { %p1346_p10 = pnand %p1344_p3, %p1304_p8  ;;  %p1352_p12 = scmp.lt.s32.totalorder %s1350_s29, %s1343_s17 }
  0x44   : > { %p1347_p11 = pneg %p1346_p10  ;;  %p1353_p7 = por %p1352_p12, %p1351_p2 }
  0x46   : > { %p1354_p1 = pnand %p1353_p7, %p1347_p11 }
  0x48   : > { %1357 = shalt.err (!%p1354_p1)
}
  0x49   : > { %s1491_s27 = smov 128   ;;  %s1492_s8 = smov 8  }
  0x4a   : > { %1215 = dma.hbm_to_vmem [thread:$0]  (!%p1583_p6), %s1651_s24, 512, %s1610_s30, %s1587_s12, %s1491_s27, %s1491_s27, %s1492_s8  }
  0x4b   : > { %p1360_p8 = pneg %p1655_p0  ;;  %s1369_s14 = scalar_lea.vmem %s1643_s15, 256 }
  0x4c   : > { %p1370_p3 = scmp.ne.s32.totalorder %s1643_s15, %s1369_s14  ;;  %p1377_p2 = scmp.lt.s32.totalorder %s1643_s15, %s1643_s15 }
  0x4d   : > { %p1378_p7 = scmp.lt.s32.totalorder %s1369_s14, %s1369_s14 }
  0x4e   : > { %p1372_p4 = pnand %p1370_p3, %p1360_p8 }
  0x4f   : > { %p1379_p13 = por %p1378_p7, %p1377_p2 }
  0x50   : > { %p1373_p12 = pneg %p1372_p4 }
  0x52   : > { %p1380_p5 = pnand %p1379_p13, %p1373_p12 }
  0x54   : > { %1383 = shalt.err (!%p1380_p5)
}
  0x55   : > { %s1493_s16 = smov 64   ;;  %s1494_s17 = smov 4  }
  0x56   : > { %1208 = dma.hbm_to_vmem [thread:$0]  (!%p1655_p0), %s1890_s1, 256, %s1643_s15, [#allocation7], %s1493_s16, %s1493_s16, %s1494_s17  }
  0x57   : > { %p1907_p6 = scmp.ne.s32.totalorder %s1905_s13, 0 }
  0x58   : > { %s249_s12 = sand.u32 (!%p1907_p6), 1, %s1613_s6   ;;  %s1698_s30 = sand.u32 (!%p1907_p6), 1, %s1478_s19  }
  0x59   : > { %247 = sbr.rel (%p1907_p6) target bundleno = 1417 (0x589), region = 36  ;;  %s1075_s24 = sshll.u32 (!%p1907_p6), %s1698_s30, 2 }
  0x5a   : > { %s250_s28 = scalar_lea.sflag (!%p1907_p6), [#allocation4], %s249_s12  ;;  %s253_s29 = scalar_lea.vmem (!%p1907_p6), [#allocation3], %s1075_s24 }
  0x5b   : > { %p1908_p9 = scmp.ne.s32.totalorder (!%p1907_p6), %s1901_s7, 0 }
  0x5e   : > { %1453 = dma.done.wait (%p1908_p9), %s250_s28, 64  }
  0x5f   : > { %1455 = vsyncadd (%p1908_p9), %s250_s28, 4294967232  ;;  %p1909_p0 = scmp.eq.s32.totalorder %s1613_s6, 0 }
  0x61   : > { %1457 = dma.done.wait (%p1909_p0), [#allocation7], 256   ;;  %p1910_p10 = pmov %p1909_p0 }
  0x62   : > { %s1077_s13 = sshll.u32 %s1698_s30, 5 }
  0x63   : > { %1459 = vsyncadd (%p1910_p10), [#allocation7], 4294967040  ;;  %s1712_s15 = scalar_lea.vmem [#allocation8], %s1077_s13 }
  0x64   : > { %1461 = dma.done.wait (%p1908_p9), %s250_s28, 512  }
  0x65   : > { %1463 = vsyncadd (%p1908_p9), %s250_s28, 4294966784  ;;  %v1495_v0 = vmov 0.0   ;;  %vm1496_vm0 = vmmov 0   ;;  %v1275_v1 = vld [vmem:[#allocation6 + $0x8] sm:$0xff]   ;;  %v1276_v2 = vld [vmem:[#allocation6] sm:$0xff]   ;;  %vm328_vm1 = vcmask 261120  }
  0x66   : > { %1137 = vmatprep.subr.bf16.mxu0 %v1495_v0  ;;  %1141 = vmatprep.mubr.msk.bf16.mxu0 %vm1496_vm0, %v1495_v0  ;;  %v304_v3 = vld [vmem:[%s253_s29] sm:$0xf]  ;;  %v1080_v4 = vld [vmem:[%s1891_s2] ss:$0 sm:$0xff]  ;;  %vm374_vm2 = vcmask 257024   ;;  %s1497_s27 = smov 96  }
  0x67   : > { %1145 = vmatprep.subr.bf16.mxu1 %v1495_v0  ;;  %1147 = vmatprep.mubr.msk.bf16.mxu1 %vm1496_vm0, %v1495_v0  ;;  %s1498_s8 = smov 120   ;;  %vm394_vm3 = vcmask 64512   ;;  %s1499_s14 = smov 112   ;;  %v393_v32 = vld [vmem:[%s1712_s15] sm:$0xff]  ;;  %v1087_v39 = vld [vmem:[%s1712_s15 + $0x8] sm:$0xff]  ;;  %v1094_v46 = vld [vmem:[%s1712_s15 + $0x10] sm:$0xff] }
  0x68   : > { %1138 = vmatpush3.bf16.msra.mxu0 %v1275_v1  ;;  %s1500_s16 = smov 104   ;;  %s1762_s17 = scalar_lea.vmem [#allocation10], %s1077_s13  ;;  %v1101_v53 = vld [vmem:[%s1712_s15 + $0x18] sm:$0xff]  ;;  %vm457_vm4 = vcmask 1043456  }
  0x69   : > { %1139 = vmatprep.subr.bf16.mxu0 %v1495_v0  ;;  %s1501_s23 = smov 64   ;;  %s1078_s10 = sshll.u32 %s1698_s30, 3 }
  0x6a   : > { %s1806_s12 = scalar_lea.vmem [#allocation9], %s1078_s10  ;;  %s1502_s24 = smov 8  }
  0x6b   : > { %s930_s28 = sshll.u32 %s1762_s17, 4  ;;  %s1117_s29 = sshll.u32 %s1613_s6, 9  ;;  %s1812_s28 = int_to_ptr.vmem [resolvable:$true] %s930_s28 }
  0x6c   : > { %1140 = vmatpush3.bf16.msra.mxu0 %v1276_v2  ;;  %s1818_s7 = scalar_lea.hbm %s1894_s5, %s1117_s29  ;;  %s1503_s26 = smov 16  }
  0x6d   : > { %1151 = vmatprep.subr.bf16.mxu0 %v1495_v0  ;;  %p1911_p1 = scmp.ne.s32.totalorder %s1903_s9, 0 }
  0x6f   : > { %1142 = vmatmul.mubr.msk.bf16.vlgmr.msra.gmra.mxu0 %vm328_vm1, %v304_v3 }
  0x70   : > { %1153 = vmatprep.mubr.msk.bf16.mxu0 %vm1496_vm0, %v1495_v0 }
 0x12f   : > { %v366_v5 = vpop.f32.mrf.mxu0 }
 0x130   : > { %v367_v6 = vadd.f32 %v1080_v4, %v366_v5 }
 0x131   : > { %v1143_v7 = vpop.f32.mrf.mxu0 }
 0x132   : > { %v372_v8 = vmul.f32 0.35355338, %v367_v6  ;;  %v1731_v9 = vpack.c.bf16 %v367_v6, %v367_v6 }
 0x133   : > { %v369_v10 = vpop.f32.mrf.mxu0 }
 0x134   : > { %v373_v11 = vpack.c.bf16 %v372_v8, %v372_v8  ;;  %380 = vrot.lane.b32.xlu0 %v1731_v9, %s1497_s27  ;;  %s904_s27 = scalar_lea.sflag [#allocation11], %s1698_s30 }
 0x135   : > { %v1144_v12 = vpop.f32.mrf.mxu0 }
 0x136   : > { %375 = vst.msk [vmem:[#allocation2] sm:$0xf] %vm374_vm2, %v373_v11 }
 0x13d   : > { %v1277_v13 = vld [vmem:[#allocation2] ss:$0 sps:$4 sm:$0xff]  }
 0x13e   : > { %510 = vrot.lane.b32.xlu1 %v1277_v13, %s1498_s8  ;;  %v1280_v19 = vld [vmem:[#allocation2] ss:$0 sps:$4 sm:$0xff]  }
 0x13f   : > { %v390_v21 = vld [vmem:[#allocation2] sm:$0xf] }
 0x140   : > { %v1282_v22 = vld [vmem:[#allocation2] ss:$0 sps:$4 sm:$0xff]  }
 0x1a6   : > { %v381_v14 = vpop.permute.xlu0 %380 }
 0x1a7   : > { %384 = vst.msk [vmem:[#allocation2 + $0x4] sm:$0xf] %vm374_vm2, %v381_v14 }
 0x1ae   : > { %v391_v15 = vld [vmem:[#allocation2 + $0x4] sm:$0xf] }
 0x1af   : > { %v1278_v16 = vld [vmem:[#allocation2 + $0x4] ss:$0 sps:$4 sm:$0xff]   ;;  %v399_v17 = vsel %vm394_vm3, %v391_v15, 0 }
 0x1b0   : > { %v1279_v18 = vld [vmem:[#allocation2 + $0x4] ss:$0 sps:$4 sm:$0xff]   ;;  %1146 = vmatpush3.bf16.xpose.msra.mxu1 %v399_v17  ;;  %515 = vrot.lane.b32.xlu0 %v1278_v16, %s1498_s8  ;;  %v511_v25 = vpop.permute.xlu1 %510 }
 0x1b1   : > { %647 = vrot.lane.b32.xlu1 %v1279_v18, %s1499_s14  ;;  %1157 = vmatprep.subr.bf16.mxu1 %v1495_v0  ;;  %v1281_v20 = vld [vmem:[#allocation2 + $0x4] ss:$0 sps:$4 sm:$0xff]  }
 0x1b4   : > { %642 = vrot.lane.b32.xlu0 %v1280_v19, %s1499_s14 }
 0x1b5   : > { %779 = vrot.lane.b32.xlu1 %v1281_v20, %s1500_s16 }
 0x1b7   : > { %1148 = vmatmul.mubr.msk.bf16.vlgmr.msra.gmra.mxu1 %vm394_vm3, %v390_v21 }
 0x1b8   : > { %774 = vrot.lane.b32.xlu0 %v1282_v22, %s1500_s16  ;;  %1159 = vmatprep.mubr.msk.bf16.mxu1 %vm1496_vm0, %v1495_v0 }
 0x222   : > { %v516_v23 = vpop.permute.xlu0 %515 }
 0x223   : > { %v521_v24 = vsel %vm394_vm3, %v516_v23, 0  ;;  %v648_v26 = vpop.permute.xlu1 %647 }
 0x224   : > { %1158 = vmatpush3.bf16.xpose.msra.mxu1 %v521_v24  ;;  %v653_v27 = vsel %vm394_vm3, %v648_v26, 0 }
 0x225   : > { %1169 = vmatprep.subr.bf16.mxu1 %v1495_v0 }
 0x226   : > { %v643_v29 = vpop.permute.xlu0 %642 }
 0x227   : > { %v780_v28 = vpop.permute.xlu1 %779 }
 0x228   : > { %v785_v30 = vsel %vm394_vm3, %v780_v28, 0 }
 0x22a   : > { %v775_v31 = vpop.permute.xlu0 %774 }
 0x22b   : > { %1160 = vmatmul.mubr.msk.bf16.vlgmr.msra.gmra.mxu1 %vm394_vm3, %v511_v25 }
 0x22c   : > { %1170 = vmatpush3.bf16.xpose.msra.mxu1 %v653_v27  ;;  %1171 = vmatprep.mubr.msk.bf16.mxu1 %vm1496_vm0, %v1495_v0 }
 0x22d   : > { %1181 = vmatprep.subr.bf16.mxu1 %v1495_v0 }
 0x233   : > { %1172 = vmatmul.mubr.msk.bf16.vlgmr.msra.gmra.mxu1 %vm394_vm3, %v643_v29 }
 0x234   : > { %1182 = vmatpush3.bf16.xpose.msra.mxu1 %v785_v30  ;;  %1183 = vmatprep.mubr.msk.bf16.mxu1 %vm1496_vm0, %v1495_v0 }
 0x23b   : > { %1184 = vmatmul.mubr.msk.bf16.vlgmr.msra.gmra.mxu1 %vm394_vm3, %v775_v31 }
 0x277   : > { %v435_v33 = vpop.f32.mrf.mxu1 }
 0x278   : > { %v436_v34 = vadd.f32 %v435_v33, %v393_v32 }
 0x279   : > { %v1149_v35 = vpop.f32.mrf.mxu1 }
 0x27a   : > { %441 = vst.msk [vmem:[%s1762_s17] sm:$0xff] %vm394_vm3, %v436_v34  ;;  %v442_v36 = vsel %vm394_vm3, %v436_v34, -inf }
 0x27b   : > { %443 = vmax.xlane.f32.xlu1 %v442_v36  ;;  %v438_v37 = vpop.f32.mrf.mxu1 }
 0x27d   : > { %v1150_v38 = vpop.f32.mrf.mxu1 }
 0x2eb   : > { %v557_v40 = vpop.f32.mrf.mxu1 }
 0x2ec   : > { %v558_v41 = vadd.f32 %v1087_v39, %v557_v40 }
 0x2ed   : > { %v1161_v42 = vpop.f32.mrf.mxu1 }
 0x2ee   : > { %1091 = vst.msk [vmem:[%s1762_s17 + $0x8] sm:$0xff] %vm394_vm3, %v558_v41  ;;  %v565_v43 = vsel %vm394_vm3, %v558_v41, -inf }
 0x2ef   : > { %566 = vmax.xlane.f32.xlu0 %v565_v43  ;;  %v560_v44 = vpop.f32.mrf.mxu1 }
 0x2f1   : > { %v1162_v45 = vpop.f32.mrf.mxu1 }
 0x2f3   : > { %v689_v47 = vpop.f32.mrf.mxu1 }
 0x2f4   : > { %v690_v48 = vadd.f32 %v1094_v46, %v689_v47 }
 0x2f5   : > { %v1173_v49 = vpop.f32.mrf.mxu1 }
 0x2f6   : > { %1098 = vst.msk [vmem:[%s1762_s17 + $0x10] sm:$0xff] %vm394_vm3, %v690_v48  ;;  %v697_v50 = vsel %vm394_vm3, %v690_v48, -inf }
 0x2f7   : > { %698 = vmax.xlane.f32.xlu0 %v697_v50  ;;  %v692_v51 = vpop.f32.mrf.mxu1 }
 0x2f9   : > { %v1174_v52 = vpop.f32.mrf.mxu1 }
 0x2fb   : > { %v821_v54 = vpop.f32.mrf.mxu1 }
 0x2fc   : > { %v822_v55 = vadd.f32 %v1101_v53, %v821_v54 }
 0x2fd   : > { %v1185_v56 = vpop.f32.mrf.mxu1 }
 0x2fe   : > { %1105 = vst.msk [vmem:[%s1762_s17 + $0x18] sm:$0xff] %vm394_vm3, %v822_v55  ;;  %v829_v57 = vsel %vm394_vm3, %v822_v55, -inf }
 0x2ff   : > { %830 = vmax.xlane.f32.xlu1 %v829_v57  ;;  %v824_v58 = vpop.f32.mrf.mxu1 }
 0x301   : > { %v1186_v59 = vpop.f32.mrf.mxu1 }
 0x304   : > { %v444_v60 = vpop.xlane.xlu1 %443 }
 0x305   : > { %v445_v61 = vsub.f32 %v436_v34, %v444_v60 }
 0x307   : > { %v446_v62 = vmul.f32 1.442695, %v445_v61 }
 0x309   : > { %1286 = vpow2.f32 %v446_v62 }
 0x30d   : > { %385 = vrot.lane.b32.xlu0 %v1731_v9, %s1501_s23 }
 0x316   : > { %v1287_v63 = vpop.eup %1286 }
 0x317   : > { %v448_v1 = vsel %vm394_vm3, %v1287_v63, 0.0 }
 0x318   : > { %449 = vadd.xlane.f32.xlu1 %v448_v1 }
 0x378   : > { %v567_v2 = vpop.xlane.xlu0 %566 }
 0x379   : > { %v568_v3 = vsub.f32 %v558_v41, %v567_v2 }
 0x37b   : > { %v569_v4 = vmul.f32 1.442695, %v568_v3 }
 0x37d   : > { %1288 = vpow2.f32 %v569_v4 }
 0x380   : > { %v699_v5 = vpop.xlane.xlu0 %698 }
 0x381   : > { %v700_v6 = vsub.f32 %v690_v48, %v699_v5 }
 0x383   : > { %v701_v7 = vmul.f32 1.442695, %v700_v6 }
 0x384   : > { %v386_v8 = vpop.permute.xlu0 %385 }
 0x385   : > { %1290 = vpow2.f32 %v701_v7  ;;  %389 = vst.msk [vmem:[#allocation2 + $0x8] sm:$0xf] %vm374_vm2, %v386_v8 }
 0x388   : > { %v831_v10 = vpop.xlane.xlu1 %830 }
 0x389   : > { %v832_v11 = vsub.f32 %v822_v55, %v831_v10 }
 0x38a   : > { %v1289_v12 = vpop.eup %1288 }
 0x38b   : > { %v833_v9 = vmul.f32 1.442695, %v832_v11  ;;  %v571_v13 = vsel %vm394_vm3, %v1289_v12, 0.0 }
 0x38c   : > { %572 = vadd.xlane.f32.xlu1 %v571_v13  ;;  %v392_v14 = vld [vmem:[#allocation2 + $0x8] sm:$0xf] }
 0x38d   : > { %v1283_v15 = vld [vmem:[#allocation2 + $0x8] ss:$0 sps:$4 sm:$0xff]   ;;  %1292 = vpow2.f32 %v833_v9  ;;  %v459_v16 = vsel %vm457_vm4, %v392_v14, 0 }
 0x38e   : > { %1152 = vmatpush3.bf16.msra.mxu0 %v459_v16  ;;  %712 = vrot.lane.b32.xlu0 %v1283_v15, %s1499_s14  ;;  %v1284_v17 = vld [vmem:[#allocation2 + $0x8] ss:$0 sps:$4 sm:$0xff]   ;;  %s1504_s14 = smov [#allocation10]  }
 0x38f   : > { %1163 = vmatprep.subr.bf16.mxu0 %v1495_v0  ;;  %v1285_v23 = vld [vmem:[#allocation2 + $0x8] ss:$0 sps:$4 sm:$0xff]  }
 0x392   : > { %v1291_v18 = vpop.eup %1290  ;;  %844 = vrot.lane.b32.xlu0 %v1284_v17, %s1500_s16  ;;  %s1388_s16 = sshll.u32 %s1504_s14, 4  ;;  %s1389_s16 = int_to_ptr.vmem [resolvable:$false] %s1388_s16 }
 0x393   : > { %v703_v19 = vsel %vm394_vm3, %v1291_v18, 0.0  ;;  %s1390_s17 = scalar_lea.vmem %s1389_s16, 1024  ;;  %p1391_p4 = scmp.lt.s32.totalorder %s1812_s28, %s1389_s16 }
 0x394   : > { %704 = vadd.xlane.f32.xlu1 %v703_v19 }
 0x39a   : > { %v1293_v20 = vpop.eup %1292 }
 0x39b   : > { %v835_v21 = vsel %vm394_vm3, %v1293_v20, 0.0 }
 0x39c   : > { %836 = vadd.xlane.f32.xlu1 %v835_v21 }
 0x3a1   : > { %v450_v22 = vpop.xlane.xlu1 %449 }
 0x3a2   : > { %1294 = vrcp.f32 %v450_v22 }
 0x3ad   : > { %580 = vrot.lane.b32.xlu1 %v1285_v23, %s1498_s8  ;;  %s1384_s8 = scalar_lea.vmem %s1812_s28, 512 }
 0x3ae   : > { %p1385_p11 = scmp.ne.s32.totalorder %s1812_s28, %s1384_s8  ;;  %p1392_p12 = scmp.lt.s32.totalorder %s1390_s17, %s1384_s8 }
 0x3af   : > { %v1295_v24 = vpop.eup %1294 }
 0x3b0   : > { %v452_v25 = vmul.f32 %v1295_v24, %v1287_v63  ;;  %p1386_p8 = pnand %p1385_p11, %p1911_p1  ;;  %p1393_p2 = por %p1392_p12, %p1391_p4 }
 0x3b2   : > { %v453_v26 = vpack.c.bf16 %v452_v25, %v452_v25  ;;  %p1387_p3 = pneg %p1386_p8 }
 0x3b4   : > { %1154 = vmatmul.mubr.msk.bf16.vlgmr.msra.gmra.mxu0 %vm394_vm3, %v453_v26  ;;  %p1394_p7 = pnand %p1393_p2, %p1387_p3 }
 0x3b5   : > { %1165 = vmatprep.mubr.msk.bf16.mxu0 %vm1496_vm0, %v1495_v0 }
 0x400   : > { %v713_v34 = vpop.permute.xlu0 %712 }
 0x401   : > { %v718_v37 = vsel %vm457_vm4, %v713_v34, 0 }
 0x404   : > { %v845_v39 = vpop.permute.xlu0 %844 }
 0x405   : > { %v850_v42 = vsel %vm457_vm4, %v845_v39, 0 }
 0x415   : > { %v573_v27 = vpop.xlane.xlu1 %572 }
 0x416   : > { %1296 = vrcp.f32 %v573_v27 }
 0x41d   : > { %v705_v28 = vpop.xlane.xlu1 %704 }
 0x41e   : > { %1298 = vrcp.f32 %v705_v28 }
 0x423   : > { %v1297_v29 = vpop.eup %1296 }
 0x424   : > { %v575_v31 = vmul.f32 %v1297_v29, %v1289_v12 }
 0x425   : > { %v837_v30 = vpop.xlane.xlu1 %836 }
 0x426   : > { %1300 = vrcp.f32 %v837_v30  ;;  %v576_v35 = vpack.c.bf16 %v575_v31, %v575_v31 }
 0x429   : > { %v581_v32 = vpop.permute.xlu1 %580 }
 0x42a   : > { %v586_v33 = vsel %vm457_vm4, %v581_v32, 0 }
 0x42b   : > { %1164 = vmatpush3.bf16.msra.mxu0 %v586_v33  ;;  %v1299_v36 = vpop.eup %1298 }
 0x42c   : > { %1175 = vmatprep.subr.bf16.mxu0 %v1495_v0  ;;  %v707_v38 = vmul.f32 %v1299_v36, %v1291_v18 }
 0x42e   : > { %1166 = vmatmul.mubr.msk.bf16.vlgmr.msra.gmra.mxu0 %vm394_vm3, %v576_v35  ;;  %v708_v40 = vpack.c.bf16 %v707_v38, %v707_v38 }
 0x42f   : > { %1176 = vmatpush3.bf16.msra.mxu0 %v718_v37  ;;  %1177 = vmatprep.mubr.msk.bf16.mxu0 %vm1496_vm0, %v1495_v0 }
 0x430   : > { %1187 = vmatprep.subr.bf16.mxu0 %v1495_v0 }
 0x433   : > { %v1301_v41 = vpop.eup %1300 }
 0x434   : > { %v839_v43 = vmul.f32 %v1301_v41, %v1293_v20 }
 0x436   : > { %1178 = vmatmul.mubr.msk.bf16.vlgmr.msra.gmra.mxu0 %vm394_vm3, %v708_v40  ;;  %v840_v44 = vpack.c.bf16 %v839_v43, %v839_v43 }
 0x437   : > { %1188 = vmatpush3.bf16.msra.mxu0 %v850_v42  ;;  %1189 = vmatprep.mubr.msk.bf16.mxu0 %vm1496_vm0, %v1495_v0 }
 0x43e   : > { %1190 = vmatmul.mubr.msk.bf16.vlgmr.msra.gmra.mxu0 %vm394_vm3, %v840_v44 }
 0x474   : > { %v495_v45 = vpop.f32.mrf.mxu0 }
 0x475   : > { %501 = vst.msk [vmem:[%s1806_s12] sm:$0xff] %vm394_vm3, %v495_v45 }
 0x476   : > { %v1155_v46 = vpop.f32.mrf.mxu0 }
 0x478   : > { %v498_v47 = vpop.f32.mrf.mxu0 }
 0x47a   : > { %v1156_v48 = vpop.f32.mrf.mxu0 }
 0x4ee   : > { %v622_v49 = vpop.f32.mrf.mxu0 }
 0x4ef   : > { %629 = vrot.lane.b32.xlu0 %v622_v49, %s1502_s24 }
 0x4f0   : > { %v1167_v0 = vpop.f32.mrf.mxu0 }
 0x4f2   : > { %v625_v50 = vpop.f32.mrf.mxu0 }
 0x4f4   : > { %v1168_v51 = vpop.f32.mrf.mxu0 }
 0x4f6   : > { %v754_v52 = vpop.f32.mrf.mxu0 }
 0x4f7   : > { %761 = vrot.lane.b32.xlu0 %v754_v52, %s1503_s26 }
 0x4f8   : > { %v1179_v53 = vpop.f32.mrf.mxu0 }
 0x4f9   : > { %1397 = shalt.err (!%p1394_p7)
}
 0x4fa   : > { %s1398_s23 = scalar_lea.hbm %s1818_s7, 512  ;;  %s1402_s13 = scalar_lea.hbm %s1894_s5, 1024 }
 0x4fb   : > { %p1399_p13 = scmp.ne.s32.totalorder %s1818_s7, %s1398_s23  ;;  %p1403_p9 = scmp.lt.s32.totalorder %s1818_s7, %s1894_s5 }
 0x4fc   : > { %p1404_p0 = scmp.lt.s32.totalorder %s1402_s13, %s1398_s23 }
 0x4fd   : > { %p1400_p5 = pnand %p1399_p13, %p1911_p1 }
 0x4fe   : > { %p1405_p10 = por %p1404_p0, %p1403_p9 }
 0x4ff   : > { %p1401_p6 = pneg %p1400_p5 }
 0x501   : > { %p1406_p11 = pnand %p1405_p10, %p1401_p6 }
 0x503   : > { %1409 = shalt.err (!%p1406_p11)
}
 0x504   : > { %s1505_s8 = smov 128   ;;  %v757_v54 = vpop.f32.mrf.mxu0  ;;  %s1506_s14 = smov 24   ;;  %vm632_vm5 = vcmask 130112   ;;  %vm764_vm6 = vcmask 195712   ;;  %vm896_vm7 = vcmask 261312  }
 0x505   : > { %1202 = dma.vmem_to_hbm [thread:$0]  (%p1911_p1), %s1812_s28, 512, %s1818_s7, %s904_s27, %s1505_s8, %s1505_s8, %s1502_s24  }
 0x506   : > { %v1180_v55 = vpop.f32.mrf.mxu0  ;;  %s1110_s16 = sshll.u32 %s1613_s6, 7  ;;  %s917_s24 = sshll.u32 %s1806_s12, 4  ;;  %s918_s24 = int_to_ptr.vmem [resolvable:$true] %s917_s24 }
 0x507   : > { %s1851_s27 = scalar_lea.hbm %s1893_s4, %s1110_s16  ;;  %s899_s17 = scalar_lea.sflag [#allocation5], %s1698_s30 }
 0x508   : > { %v886_v56 = vpop.f32.mrf.mxu0  ;;  %s1410_s23 = scalar_lea.vmem %s918_s24, 128  ;;  %s1507_s10 = smov [#allocation9]  }
 0x509   : > { %893 = vrot.lane.b32.xlu1 %v886_v56, %s1506_s14  ;;  %p1411_p8 = scmp.ne.s32.totalorder %s918_s24, %s1410_s23  ;;  %s1414_s29 = sshll.u32 %s1507_s10, 4  ;;  %s1415_s29 = int_to_ptr.vmem [resolvable:$false] %s1414_s29 }
 0x50a   : > { %v1191_v57 = vpop.f32.mrf.mxu0  ;;  %s1416_s6 = scalar_lea.vmem %s1415_s29, 256  ;;  %p1417_p12 = scmp.lt.s32.totalorder %s918_s24, %s1415_s29 }
 0x50b   : > { %p1412_p3 = pnand %p1411_p8, %p1911_p1  ;;  %p1418_p2 = scmp.lt.s32.totalorder %s1416_s6, %s1410_s23 }
 0x50c   : > { %v889_v58 = vpop.f32.mrf.mxu0 }
 0x50d   : > { %p1413_p4 = pneg %p1412_p3  ;;  %p1419_p7 = por %p1418_p2, %p1417_p12 }
 0x50e   : > { %v1192_v59 = vpop.f32.mrf.mxu0 }
 0x50f   : > { %p1420_p13 = pnand %p1419_p7, %p1413_p4 }
 0x561   : > { %v630_v60 = vpop.permute.xlu0 %629 }
 0x562   : > { %633 = vst.msk [vmem:[%s1806_s12] sm:$0xff] %vm632_vm5, %v630_v60 }
 0x569   : > { %v762_v61 = vpop.permute.xlu0 %761 }
 0x56a   : > { %765 = vst.msk [vmem:[%s1806_s12] sm:$0xff] %vm764_vm6, %v762_v61 }
 0x57b   : > { %v894_v62 = vpop.permute.xlu1 %893 }
 0x57c   : > { %897 = vst.msk [vmem:[%s1806_s12] sm:$0xff] %vm896_vm7, %v894_v62 }
 0x57d   : > { %1423 = shalt.err (!%p1420_p13)
}
 0x57e   : > { %s1424_s12 = scalar_lea.hbm %s1851_s27, 128  ;;  %s1428_s15 = scalar_lea.hbm %s1893_s4, 256 }
 0x57f   : > { %p1425_p5 = scmp.ne.s32.totalorder %s1851_s27, %s1424_s12  ;;  %p1429_p0 = scmp.lt.s32.totalorder %s1851_s27, %s1893_s4 }
 0x580   : > { %p1430_p10 = scmp.lt.s32.totalorder %s1428_s15, %s1424_s12 }
 0x581   : > { %p1426_p6 = pnand %p1425_p5, %p1911_p1 }
 0x582   : > { %p1431_p11 = por %p1430_p10, %p1429_p0 }
 0x583   : > { %p1427_p9 = pneg %p1426_p6 }
 0x585   : > { %p1432_p8 = pnand %p1431_p11, %p1427_p9 }
 0x587   : > { %1435 = shalt.err (!%p1432_p8)
}
 0x588   : > { %1201 = dma.vmem_to_hbm [thread:$0]  (%p1911_p1), %s918_s24, 128, %s1851_s27, %s899_s17  }
 0x589 PF: > { %s945_s14 = sand.u32 1, %s1474_s18   ;;  %p1912_p3 = scmp.ne.s32.totalorder %s1904_s11, 0 }
 0x58a   : > { %p1913_p4 = scmp.ge.s32.totalorder %s1486_s21, 2  ;;  %s946_s16 = scalar_lea.sflag [#allocation5], %s945_s14 }
 0x58c   : > { %p1217_p12 = pnand %p1913_p4, %p1912_p3 }
 0x58e   : > { %p1218_p2 = pneg %p1217_p12 }
 0x590   : > { %1465 = dma.done.wait (%p1218_p2), %s946_s16, 128  }
 0x591   : > { %1467 = vsyncadd (%p1218_p2), %s946_s16, 4294967168  ;;  %s955_s28 = scalar_lea.sflag [#allocation11], %s945_s14 }
 0x592   : > { %1469 = dma.done.wait (%p1218_p2), %s955_s28, 512  }
 0x593   : > { %1471 = vsyncadd (%p1218_p2), %s955_s28, 4294966784  ;;  %p23_p1 = scmp.ge.s32.totalorder %s1559_s22, 4   ;;  %s1914_s18 = smov %s1478_s19 }
 0x594   : > { %s1915_s19 = smov %s1482_s20  ;;  %s1916_s20 = smov %s1570_s25 }
 0x595   : > { %s1917_s21 = smov %s1559_s22  ;;  %25 = sbr.rel (!%p23_p1) target bundleno = 8 (0x8), region = 121 }
 0x59a   :  { %960 = vsyncpa [#allocation4], 1 }
 0x59b   :  { %962 = vsyncpa [#allocation4 + $0x1], 1 }
 0x59c   :  { %963 = vsyncpa [#allocation7], 1 }
 0x59d   :  { %964 = vsyncpa [#allocation5], 1 }
 0x59e   :  { %966 = vsyncpa [#allocation5 + $0x1], 1 }
 0x59f   :  { %967 = vsyncpa [#allocation11], 1 }
 0x5a0   :  { %969 = vsyncpa [#allocation11 + $0x1], 1 }

// kernel: tpu_custom_call.1
= control target key start
LH: loop header
LB: loop body
LE: loop exit
PB: predicated region body
PF: predicated region fallthrough
CT: control target
= control target key end

     0   :  { %11 = vsyncpa [#allocation4], 0  ;;  %s1889_s0 = inlined_call_operand.hbm [shape: bf16[2,8,32], index: 0, kind: input, shape index: {}]   ;;  %s1890_s1 = inlined_call_operand.hbm [shape: bf16[32,96], index: 1, kind: input, shape index: {}]   ;;  %s1891_s2 = inlined_call_operand.vmem [shape: f32[1,96], index: 2, kind: input, shape index: {}]   ;;  %s1892_s3 = inlined_call_operand.hbm [shape: f32[2,4,8,8], index: 3, kind: input, shape index: {}]   ;;  %s1893_s4 = inlined_call_operand.hbm [shape: f32[2,8,32], index: 4, kind: output, shape index: {0}]   ;;  %s1894_s5 = inlined_call_operand.hbm [shape: f32[2,4,8,8], index: 5, kind: output, shape index: {1}]  }
   0x1   :  { %13 = vsyncpa [#allocation4 + $0x1], 0 }
   0x2   :  { %14 = vsyncpa [#allocation7], 0 }
   0x3   :  { %15 = vsyncpa [#allocation5], 0 }
   0x4   :  { %17 = vsyncpa [#allocation5 + $0x1], 0 }
   0x5   :  { %18 = vsyncpa [#allocation11], 0 }
   0x6   :  { %20 = vsyncpa [#allocation11 + $0x1], 0  ;;  %s1538_s18 = smov 0   ;;  %s1540_s19 = smov 0  }
   0x7   :  { %s1542_s20 = smov 0   ;;  %s1544_s21 = smov 0  }
   0x8 LB: > { %s1559_s22 = sadd.s32 1, %s1486_s21   ;;  %s33_s23 = sadd.s32 1, %s1482_s20  ;;  %s1486_s21 = sphi %s1544_s21, %s1917_s21   ;;  %s1482_s20 = sphi %s1542_s20, %s1916_s20   ;;  %s1478_s19 = sphi %s1540_s19, %s1915_s19   ;;  %s1474_s18 = sphi %s1538_s18, %s1914_s18  }
   0x9   : > { %s30_s24 = ssub.s32 %s1486_s21, %s1559_s22  ;;  %p1895_p0 = scmp.ne.s32.totalorder %s1482_s20, %s1478_s19 }
   0xa   : > { %p31_p1 = scmp.eq.s32.totalorder %s30_s24, 0  ;;  %p41_p2 = scmp.eq.s32.totalorder %s1486_s21, 0 }
   0xb   : > { %p1224_p4 = scmp.lt.s32.totalorder %s1486_s21, 2  ;;  %s206_s26 = sand.u32 1, %s1486_s21  }
   0xc   : > { %s1570_s25 = scalar_select %p31_p1, %s1482_s20, %s33_s23  }
   0xd   : > { %p42_p5 = por %p41_p2, %p1895_p0  ;;  %s208_s27 = sand.u32 1, %s1482_s20  }
   0xe   : > { %s1069_s28 = sshll.u32 %s208_s27, 2  ;;  %s1070_s29 = sshll.u32 %s1486_s21, 6 }
   0xf   : > { %s1581_s7 = scalar_lea.hbm %s1889_s0, %s1070_s29  ;;  %s210_s8 = scalar_lea.vmem [#allocation3], %s1069_s28 }
  0x10   : > { %s217_s9 = sshll.u32 %s210_s8, 4  ;;  %p1583_p6 = pnand %p1224_p4, %p42_p5  ;;  %s218_s9 = int_to_ptr.vmem [resolvable:$true] %s217_s9 }
  0x11   : > { %s1071_s11 = sshll.u32 %s208_s27, 5  ;;  %s1587_s12 = scalar_lea.sflag [#allocation4], %s206_s26 }
  0x12   : > { %s1302_s13 = scalar_lea.hbm %s1581_s7, 64  ;;  %p1304_p8 = pneg %p1583_p6 }
  0x13   : > { %p1303_p7 = scmp.ne.s32.totalorder %s1581_s7, %s1302_s13  ;;  %s1307_s16 = scalar_lea.hbm %s1889_s0, 128 }
  0x14   : > { %p1308_p11 = scmp.lt.s32.totalorder %s1581_s7, %s1889_s0  ;;  %p1309_p12 = scmp.lt.s32.totalorder %s1307_s16, %s1302_s13 }
  0x15   : > { %p1305_p9 = pnand %p1304_p8, %p1303_p7 }
  0x16   : > { %p1310_p13 = por %p1309_p12, %p1308_p11 }
  0x17   : > { %p1306_p10 = pneg %p1305_p9 }
  0x19   : > { %p1311_p1 = pnand %p1310_p13, %p1306_p10 }
  0x1b   : > { %1314 = shalt.err (!%p1311_p1)
}
  0x1c   : > { %s1315_s24 = scalar_lea.vmem %s218_s9, 64  ;;  %s1488_s26 = smov [#allocation3]  }
  0x1d   : > { %p1316_p2 = scmp.ne.s32.totalorder %s218_s9, %s1315_s24  ;;  %s1320_s27 = sshll.u32 %s1488_s26, 4  ;;  %s1321_s27 = int_to_ptr.vmem [resolvable:$false] %s1320_s27 }
  0x1e   : > { %s1322_s28 = scalar_lea.vmem %s1321_s27, 128  ;;  %p1323_p7 = scmp.lt.s32.totalorder %s218_s9, %s1321_s27 }
  0x1f   : > { %p1318_p4 = pnand %p1316_p2, %p1304_p8  ;;  %p1324_p9 = scmp.lt.s32.totalorder %s1322_s28, %s1315_s24 }
  0x21   : > { %p1319_p5 = pneg %p1318_p4  ;;  %p1325_p3 = por %p1324_p9, %p1323_p7 }
  0x23   : > { %p1326_p0 = pnand %p1325_p3, %p1319_p5 }
  0x25   : > { %1329 = shalt.err (!%p1326_p0)
}
  0x26   : > { %1212 = dma.hbm_to_vmem [thread:$0]  (!%p1583_p6), %s1581_s7, 64, %s218_s9, %s1587_s12  }
  0x27   : > { %s228_s29 = scalar_lea.vmem [#allocation8], %s1071_s11  ;;  %s1613_s6 = sadd.s32 4294967295, %s1486_s21  }
  0x28   : > { %s235_s30 = sshll.u32 %s228_s29, 4  ;;  %s1065_s8 = sadd.s32 4294967294, %s1486_s21   ;;  %s1610_s30 = int_to_ptr.vmem [resolvable:$true] %s235_s30 }
  0x29   : > { %p46_p0 = scmp.ne.s32.totalorder %s1478_s19, %s1474_s18  ;;  %p1896_p3 = scmp.eq.s32.totalorder %s1613_s6, 0 }
  0x2a   : > { %p138_p10 = scmp.eq.s32.totalorder %s1613_s6, 1  ;;  %p144_p11 = scmp.eq.s32.totalorder %s1065_s8, 1 }
  0x2b   : > { %p1622_p12 = por %p1896_p3, %p46_p0  ;;  %p1066_p13 = scmp.ge.s32.totalorder %s1486_s21, 1 }
  0x2c   : > { %p1902_p1 = scmp.ne.s32.totalorder %s1482_s20, %s1478_s19  ;;  %p1634_p4 = por %p144_p11, %p46_p0 }
  0x2d   : > { %s1901_s7 = scalar_select %p1622_p12, 1, 0 }
  0x2e   : > { %p1630_p2 = por %p138_p10, %p1902_p1  ;;  %p177_p5 = scmp.lt.s32.totalorder %s1486_s21, 3 }
  0x2f   : > { %s1904_s11 = scalar_select %p1634_p4, 1, 0 }
  0x30   : > { %s1903_s9 = scalar_select %p1630_p2, 1, 0 }
  0x31   : > { %p1639_p7 = pnand %p1066_p13, %p177_p5  ;;  %s1489_s14 = smov [#allocation6]  }
  0x32   : > { %s189_s15 = sshll.u32 %s1489_s14, 4  ;;  %s1115_s16 = sshll.u32 %s1486_s21, 9  ;;  %s1643_s15 = int_to_ptr.vmem [resolvable:$true] %s189_s15 }
  0x33   : > { %s1905_s13 = scalar_select %p1639_p7, 1, 0 }
  0x34   : > { %p1205_p9 = pneg %p1639_p7  ;;  %s1651_s24 = scalar_lea.hbm %s1892_s3, %s1115_s16 }
  0x35   : > { %s1330_s27 = scalar_lea.hbm %s1651_s24, 512  ;;  %s1335_s8 = scalar_lea.hbm %s1892_s3, 1024 }
  0x36   : > { %p1655_p0 = pnand %p1205_p9, %p1896_p3  ;;  %p1331_p10 = scmp.ne.s32.totalorder %s1651_s24, %s1330_s27 }
  0x37   : > { %p1336_p1 = scmp.lt.s32.totalorder %s1651_s24, %s1892_s3  ;;  %p1337_p5 = scmp.lt.s32.totalorder %s1335_s8, %s1330_s27 }
  0x38   : > { %p1333_p11 = pnand %p1331_p10, %p1304_p8 }
  0x39   : > { %p1338_p4 = por %p1337_p5, %p1336_p1 }
  0x3a   : > { %p1334_p13 = pneg %p1333_p11 }
  0x3c   : > { %p1339_p9 = pnand %p1338_p4, %p1334_p13 }
  0x3e   : > { %1342 = shalt.err (!%p1339_p9)
}
  0x3f   : > { %s1343_s17 = scalar_lea.vmem %s1610_s30, 512  ;;  %s1490_s23 = smov [#allocation8]  }
  0x40   : > { %p1344_p3 = scmp.ne.s32.totalorder %s1610_s30, %s1343_s17  ;;  %s1348_s28 = sshll.u32 %s1490_s23, 4  ;;  %s1349_s28 = int_to_ptr.vmem [resolvable:$false] %s1348_s28 }
  0x41   : > { %s1350_s29 = scalar_lea.vmem %s1349_s28, 1024  ;;  %p1351_p2 = scmp.lt.s32.totalorder %s1610_s30, %s1349_s28 }
  0x42   : > { %p1346_p10 = pnand %p1344_p3, %p1304_p8  ;;  %p1352_p12 = scmp.lt.s32.totalorder %s1350_s29, %s1343_s17 }
  0x44   : > { %p1347_p11 = pneg %p1346_p10  ;;  %p1353_p7 = por %p1352_p12, %p1351_p2 }
  0x46   : > { %p1354_p1 = pnand %p1353_p7, %p1347_p11 }
  0x48   : > { %1357 = shalt.err (!%p1354_p1)
}
  0x49   : > { %s1491_s27 = smov 128   ;;  %s1492_s8 = smov 8  }
  0x4a   : > { %1215 = dma.hbm_to_vmem [thread:$0]  (!%p1583_p6), %s1651_s24, 512, %s1610_s30, %s1587_s12, %s1491_s27, %s1491_s27, %s1492_s8  }
  0x4b   : > { %p1360_p8 = pneg %p1655_p0  ;;  %s1369_s14 = scalar_lea.vmem %s1643_s15, 256 }
  0x4c   : > { %p1370_p3 = scmp.ne.s32.totalorder %s1643_s15, %s1369_s14  ;;  %p1377_p2 = scmp.lt.s32.totalorder %s1643_s15, %s1643_s15 }
  0x4d   : > { %p1378_p7 = scmp.lt.s32.totalorder %s1369_s14, %s1369_s14 }
  0x4e   : > { %p1372_p4 = pnand %p1370_p3, %p1360_p8 }
  0x4f   : > { %p1379_p13 = por %p1378_p7, %p1377_p2 }
  0x50   : > { %p1373_p12 = pneg %p1372_p4 }
  0x52   : > { %p1380_p5 = pnand %p1379_p13, %p1373_p12 }
  0x54   : > { %1383 = shalt.err (!%p1380_p5)
}
  0x55   : > { %s1493_s16 = smov 64   ;;  %s1494_s17 = smov 4  }
  0x56   : > { %1208 = dma.hbm_to_vmem [thread:$0]  (!%p1655_p0), %s1890_s1, 256, %s1643_s15, [#allocation7], %s1493_s16, %s1493_s16, %s1494_s17  }
  0x57   : > { %p1907_p6 = scmp.ne.s32.totalorder %s1905_s13, 0 }
  0x58   : > { %s249_s12 = sand.u32 (!%p1907_p6), 1, %s1613_s6   ;;  %s1698_s30 = sand.u32 (!%p1907_p6), 1, %s1478_s19  }
  0x59   : > { %247 = sbr.rel (%p1907_p6) target bundleno = 1417 (0x589), region = 36  ;;  %s1075_s24 = sshll.u32 (!%p1907_p6), %s1698_s30, 2 }
  0x5a   : > { %s250_s28 = scalar_lea.sflag (!%p1907_p6), [#allocation4], %s249_s12  ;;  %s253_s29 = scalar_lea.vmem (!%p1907_p6), [#allocation3], %s1075_s24 }
  0x5b   : > { %p1908_p9 = scmp.ne.s32.totalorder (!%p1907_p6), %s1901_s7, 0 }
  0x5e   : > { %1453 = dma.done.wait (%p1908_p9), %s250_s28, 64  }
  0x5f   : > { %1455 = vsyncadd (%p1908_p9), %s250_s28, 4294967232  ;;  %p1909_p0 = scmp.eq.s32.totalorder %s1613_s6, 0 }
  0x61   : > { %1457 = dma.done.wait (%p1909_p0), [#allocation7], 256   ;;  %p1910_p10 = pmov %p1909_p0 }
  0x62   : > { %s1077_s13 = sshll.u32 %s1698_s30, 5 }
  0x63   : > { %1459 = vsyncadd (%p1910_p10), [#allocation7], 4294967040  ;;  %s1712_s15 = scalar_lea.vmem [#allocation8], %s1077_s13 }
  0x64   : > { %1461 = dma.done.wait (%p1908_p9), %s250_s28, 512  }
  0x65   : > { %1463 = vsyncadd (%p1908_p9), %s250_s28, 4294966784  ;;  %v1495_v0 = vmov 0.0   ;;  %vm1496_vm0 = vmmov 0   ;;  %v1275_v1 = vld [vmem:[#allocation6 + $0x8] sm:$0xff]   ;;  %v1276_v2 = vld [vmem:[#allocation6] sm:$0xff]   ;;  %vm328_vm1 = vcmask 261120  }
  0x66   : > { %1137 = vmatprep.subr.bf16.mxu0 %v1495_v0  ;;  %1141 = vmatprep.mubr.msk.bf16.mxu0 %vm1496_vm0, %v1495_v0  ;;  %v304_v3 = vld [vmem:[%s253_s29] sm:$0xf]  ;;  %v1080_v4 = vld [vmem:[%s1891_s2] ss:$0 sm:$0xff]  ;;  %vm374_vm2 = vcmask 257024   ;;  %s1497_s27 = smov 96  }
  0x67   : > { %1145 = vmatprep.subr.bf16.mxu1 %v1495_v0  ;;  %1147 = vmatprep.mubr.msk.bf16.mxu1 %vm1496_vm0, %v1495_v0  ;;  %s1498_s8 = smov 120   ;;  %vm394_vm3 = vcmask 64512   ;;  %s1499_s14 = smov 112   ;;  %v393_v32 = vld [vmem:[%s1712_s15] sm:$0xff]  ;;  %v1087_v39 = vld [vmem:[%s1712_s15 + $0x8] sm:$0xff]  ;;  %v1094_v46 = vld [vmem:[%s1712_s15 + $0x10] sm:$0xff] }
  0x68   : > { %1138 = vmatpush3.bf16.msra.mxu0 %v1275_v1  ;;  %s1500_s16 = smov 104   ;;  %s1762_s17 = scalar_lea.vmem [#allocation10], %s1077_s13  ;;  %v1101_v53 = vld [vmem:[%s1712_s15 + $0x18] sm:$0xff]  ;;  %vm457_vm4 = vcmask 1043456  }
  0x69   : > { %1139 = vmatprep.subr.bf16.mxu0 %v1495_v0  ;;  %s1501_s23 = smov 64   ;;  %s1078_s10 = sshll.u32 %s1698_s30, 3 }
  0x6a   : > { %s1806_s12 = scalar_lea.vmem [#allocation9], %s1078_s10  ;;  %s1502_s24 = smov 8  }
  0x6b   : > { %s930_s28 = sshll.u32 %s1762_s17, 4  ;;  %s1117_s29 = sshll.u32 %s1613_s6, 9  ;;  %s1812_s28 = int_to_ptr.vmem [resolvable:$true] %s930_s28 }
  0x6c   : > { %1140 = vmatpush3.bf16.msra.mxu0 %v1276_v2  ;;  %s1818_s7 = scalar_lea.hbm %s1894_s5, %s1117_s29  ;;  %s1503_s26 = smov 16  }
  0x6d   : > { %1151 = vmatprep.subr.bf16.mxu0 %v1495_v0  ;;  %p1911_p1 = scmp.ne.s32.totalorder %s1903_s9, 0 }
  0x6f   : > { %1142 = vmatmul.mubr.msk.bf16.vlgmr.msra.gmra.mxu0 %vm328_vm1, %v304_v3 }
  0x70   : > { %1153 = vmatprep.mubr.msk.bf16.mxu0 %vm1496_vm0, %v1495_v0 }
 0x12f   : > { %v366_v5 = vpop.f32.mrf.mxu0 }
 0x130   : > { %v367_v6 = vadd.f32 %v1080_v4, %v366_v5 }
 0x131   : > { %v1143_v7 = vpop.f32.mrf.mxu0 }
 0x132   : > { %v372_v8 = vmul.f32 0.35355338, %v367_v6  ;;  %v1731_v9 = vpack.c.bf16 %v367_v6, %v367_v6 }
 0x133   : > { %v369_v10 = vpop.f32.mrf.mxu0 }
 0x134   : > { %v373_v11 = vpack.c.bf16 %v372_v8, %v372_v8  ;;  %380 = vrot.lane.b32.xlu0 %v1731_v9, %s1497_s27  ;;  %s904_s27 = scalar_lea.sflag [#allocation11], %s1698_s30 }
 0x135   : > { %v1144_v12 = vpop.f32.mrf.mxu0 }
 0x136   : > { %375 = vst.msk [vmem:[#allocation2] sm:$0xf] %vm374_vm2, %v373_v11 }
 0x13d   : > { %v1277_v13 = vld [vmem:[#allocation2] ss:$0 sps:$4 sm:$0xff]  }
 0x13e   : > { %510 = vrot.lane.b32.xlu1 %v1277_v13, %s1498_s8  ;;  %v1280_v19 = vld [vmem:[#allocation2] ss:$0 sps:$4 sm:$0xff]  }
 0x13f   : > { %v390_v21 = vld [vmem:[#allocation2] sm:$0xf] }
 0x140   : > { %v1282_v22 = vld [vmem:[#allocation2] ss:$0 sps:$4 sm:$0xff]  }
 0x1a6   : > { %v381_v14 = vpop.permute.xlu0 %380 }
 0x1a7   : > { %384 = vst.msk [vmem:[#allocation2 + $0x4] sm:$0xf] %vm374_vm2, %v381_v14 }
 0x1ae   : > { %v391_v15 = vld [vmem:[#allocation2 + $0x4] sm:$0xf] }
 0x1af   : > { %v1278_v16 = vld [vmem:[#allocation2 + $0x4] ss:$0 sps:$4 sm:$0xff]   ;;  %v399_v17 = vsel %vm394_vm3, %v391_v15, 0 }
 0x1b0   : > { %v1279_v18 = vld [vmem:[#allocation2 + $0x4] ss:$0 sps:$4 sm:$0xff]   ;;  %1146 = vmatpush3.bf16.xpose.msra.mxu1 %v399_v17  ;;  %515 = vrot.lane.b32.xlu0 %v1278_v16, %s1498_s8  ;;  %v511_v25 = vpop.permute.xlu1 %510 }
 0x1b1   : > { %647 = vrot.lane.b32.xlu1 %v1279_v18, %s1499_s14  ;;  %1157 = vmatprep.subr.bf16.mxu1 %v1495_v0  ;;  %v1281_v20 = vld [vmem:[#allocation2 + $0x4] ss:$0 sps:$4 sm:$0xff]  }
 0x1b4   : > { %642 = vrot.lane.b32.xlu0 %v1280_v19, %s1499_s14 }
 0x1b5   : > { %779 = vrot.lane.b32.xlu1 %v1281_v20, %s1500_s16 }
 0x1b7   : > { %1148 = vmatmul.mubr.msk.bf16.vlgmr.msra.gmra.mxu1 %vm394_vm3, %v390_v21 }
 0x1b8   : > { %774 = vrot.lane.b32.xlu0 %v1282_v22, %s1500_s16  ;;  %1159 = vmatprep.mubr.msk.bf16.mxu1 %vm1496_vm0, %v1495_v0 }
 0x222   : > { %v516_v23 = vpop.permute.xlu0 %515 }
 0x223   : > { %v521_v24 = vsel %vm394_vm3, %v516_v23, 0  ;;  %v648_v26 = vpop.permute.xlu1 %647 }
 0x224   : > { %1158 = vmatpush3.bf16.xpose.msra.mxu1 %v521_v24  ;;  %v653_v27 = vsel %vm394_vm3, %v648_v26, 0 }
 0x225   : > { %1169 = vmatprep.subr.bf16.mxu1 %v1495_v0 }
 0x226   : > { %v643_v29 = vpop.permute.xlu0 %642 }
 0x227   : > { %v780_v28 = vpop.permute.xlu1 %779 }
 0x228   : > { %v785_v30 = vsel %vm394_vm3, %v780_v28, 0 }
 0x22a   : > { %v775_v31 = vpop.permute.xlu0 %774 }
 0x22b   : > { %1160 = vmatmul.mubr.msk.bf16.vlgmr.msra.gmra.mxu1 %vm394_vm3, %v511_v25 }
 0x22c   : > { %1170 = vmatpush3.bf16.xpose.msra.mxu1 %v653_v27  ;;  %1171 = vmatprep.mubr.msk.bf16.mxu1 %vm1496_vm0, %v1495_v0 }
 0x22d   : > { %1181 = vmatprep.subr.bf16.mxu1 %v1495_v0 }
 0x233   : > { %1172 = vmatmul.mubr.msk.bf16.vlgmr.msra.gmra.mxu1 %vm394_vm3, %v643_v29 }
 0x234   : > { %1182 = vmatpush3.bf16.xpose.msra.mxu1 %v785_v30  ;;  %1183 = vmatprep.mubr.msk.bf16.mxu1 %vm1496_vm0, %v1495_v0 }
 0x23b   : > { %1184 = vmatmul.mubr.msk.bf16.vlgmr.msra.gmra.mxu1 %vm394_vm3, %v775_v31 }
 0x277   : > { %v435_v33 = vpop.f32.mrf.mxu1 }
 0x278   : > { %v436_v34 = vadd.f32 %v435_v33, %v393_v32 }
 0x279   : > { %v1149_v35 = vpop.f32.mrf.mxu1 }
 0x27a   : > { %441 = vst.msk [vmem:[%s1762_s17] sm:$0xff] %vm394_vm3, %v436_v34  ;;  %v442_v36 = vsel %vm394_vm3, %v436_v34, -inf }
 0x27b   : > { %443 = vmax.xlane.f32.xlu1 %v442_v36  ;;  %v438_v37 = vpop.f32.mrf.mxu1 }
 0x27d   : > { %v1150_v38 = vpop.f32.mrf.mxu1 }
 0x2eb   : > { %v557_v40 = vpop.f32.mrf.mxu1 }
 0x2ec   : > { %v558_v41 = vadd.f32 %v1087_v39, %v557_v40 }
 0x2ed   : > { %v1161_v42 = vpop.f32.mrf.mxu1 }
 0x2ee   : > { %1091 = vst.msk [vmem:[%s1762_s17 + $0x8] sm:$0xff] %vm394_vm3, %v558_v41  ;;  %v565_v43 = vsel %vm394_vm3, %v558_v41, -inf }
 0x2ef   : > { %566 = vmax.xlane.f32.xlu0 %v565_v43  ;;  %v560_v44 = vpop.f32.mrf.mxu1 }
 0x2f1   : > { %v1162_v45 = vpop.f32.mrf.mxu1 }
 0x2f3   : > { %v689_v47 = vpop.f32.mrf.mxu1 }
 0x2f4   : > { %v690_v48 = vadd.f32 %v1094_v46, %v689_v47 }
 0x2f5   : > { %v1173_v49 = vpop.f32.mrf.mxu1 }
 0x2f6   : > { %1098 = vst.msk [vmem:[%s1762_s17 + $0x10] sm:$0xff] %vm394_vm3, %v690_v48  ;;  %v697_v50 = vsel %vm394_vm3, %v690_v48, -inf }
 0x2f7   : > { %698 = vmax.xlane.f32.xlu0 %v697_v50  ;;  %v692_v51 = vpop.f32.mrf.mxu1 }
 0x2f9   : > { %v1174_v52 = vpop.f32.mrf.mxu1 }
 0x2fb   : > { %v821_v54 = vpop.f32.mrf.mxu1 }
 0x2fc   : > { %v822_v55 = vadd.f32 %v1101_v53, %v821_v54 }
 0x2fd   : > { %v1185_v56 = vpop.f32.mrf.mxu1 }
 0x2fe   : > { %1105 = vst.msk [vmem:[%s1762_s17 + $0x18] sm:$0xff] %vm394_vm3, %v822_v55  ;;  %v829_v57 = vsel %vm394_vm3, %v822_v55, -inf }
 0x2ff   : > { %830 = vmax.xlane.f32.xlu1 %v829_v57  ;;  %v824_v58 = vpop.f32.mrf.mxu1 }
 0x301   : > { %v1186_v59 = vpop.f32.mrf.mxu1 }
 0x304   : > { %v444_v60 = vpop.xlane.xlu1 %443 }
 0x305   : > { %v445_v61 = vsub.f32 %v436_v34, %v444_v60 }
 0x307   : > { %v446_v62 = vmul.f32 1.442695, %v445_v61 }
 0x309   : > { %1286 = vpow2.f32 %v446_v62 }
 0x30d   : > { %385 = vrot.lane.b32.xlu0 %v1731_v9, %s1501_s23 }
 0x316   : > { %v1287_v63 = vpop.eup %1286 }
 0x317   : > { %v448_v1 = vsel %vm394_vm3, %v1287_v63, 0.0 }
 0x318   : > { %449 = vadd.xlane.f32.xlu1 %v448_v1 }
 0x378   : > { %v567_v2 = vpop.xlane.xlu0 %566 }
 0x379   : > { %v568_v3 = vsub.f32 %v558_v41, %v567_v2 }
 0x37b   : > { %v569_v4 = vmul.f32 1.442695, %v568_v3 }
 0x37d   : > { %1288 = vpow2.f32 %v569_v4 }
 0x380   : > { %v699_v5 = vpop.xlane.xlu0 %698 }
 0x381   : > { %v700_v6 = vsub.f32 %v690_v48, %v699_v5 }
 0x383   : > { %v701_v7 = vmul.f32 1.442695, %v700_v6 }
 0x384   : > { %v386_v8 = vpop.permute.xlu0 %385 }
 0x385   : > { %1290 = vpow2.f32 %v701_v7  ;;  %389 = vst.msk [vmem:[#allocation2 + $0x8] sm:$0xf] %vm374_vm2, %v386_v8 }
 0x388   : > { %v831_v10 = vpop.xlane.xlu1 %830 }
 0x389   : > { %v832_v11 = vsub.f32 %v822_v55, %v831_v10 }
 0x38a   : > { %v1289_v12 = vpop.eup %1288 }
 0x38b   : > { %v833_v9 = vmul.f32 1.442695, %v832_v11  ;;  %v571_v13 = vsel %vm394_vm3, %v1289_v12, 0.0 }
 0x38c   : > { %572 = vadd.xlane.f32.xlu1 %v571_v13  ;;  %v392_v14 = vld [vmem:[#allocation2 + $0x8] sm:$0xf] }
 0x38d   : > { %v1283_v15 = vld [vmem:[#allocation2 + $0x8] ss:$0 sps:$4 sm:$0xff]   ;;  %1292 = vpow2.f32 %v833_v9  ;;  %v459_v16 = vsel %vm457_vm4, %v392_v14, 0 }
 0x38e   : > { %1152 = vmatpush3.bf16.msra.mxu0 %v459_v16  ;;  %712 = vrot.lane.b32.xlu0 %v1283_v15, %s1499_s14  ;;  %v1284_v17 = vld [vmem:[#allocation2 + $0x8] ss:$0 sps:$4 sm:$0xff]   ;;  %s1504_s14 = smov [#allocation10]  }
 0x38f   : > { %1163 = vmatprep.subr.bf16.mxu0 %v1495_v0  ;;  %v1285_v23 = vld [vmem:[#allocation2 + $0x8] ss:$0 sps:$4 sm:$0xff]  }
 0x392   : > { %v1291_v18 = vpop.eup %1290  ;;  %844 = vrot.lane.b32.xlu0 %v1284_v17, %s1500_s16  ;;  %s1388_s16 = sshll.u32 %s1504_s14, 4  ;;  %s1389_s16 = int_to_ptr.vmem [resolvable:$false] %s1388_s16 }
 0x393   : > { %v703_v19 = vsel %vm394_vm3, %v1291_v18, 0.0  ;;  %s1390_s17 = scalar_lea.vmem %s1389_s16, 1024  ;;  %p1391_p4 = scmp.lt.s32.totalorder %s1812_s28, %s1389_s16 }
 0x394   : > { %704 = vadd.xlane.f32.xlu1 %v703_v19 }
 0x39a   : > { %v1293_v20 = vpop.eup %1292 }
 0x39b   : > { %v835_v21 = vsel %vm394_vm3, %v1293_v20, 0.0 }
 0x39c   : > { %836 = vadd.xlane.f32.xlu1 %v835_v21 }
 0x3a1   : > { %v450_v22 = vpop.xlane.xlu1 %449 }
 0x3a2   : > { %1294 = vrcp.f32 %v450_v22 }
 0x3ad   : > { %580 = vrot.lane.b32.xlu1 %v1285_v23, %s1498_s8  ;;  %s1384_s8 = scalar_lea.vmem %s1812_s28, 512 }
 0x3ae   : > { %p1385_p11 = scmp.ne.s32.totalorder %s1812_s28, %s1384_s8  ;;  %p1392_p12 = scmp.lt.s32.totalorder %s1390_s17, %s1384_s8 }
 0x3af   : > { %v1295_v24 = vpop.eup %1294 }
 0x3b0   : > { %v452_v25 = vmul.f32 %v1295_v24, %v1287_v63  ;;  %p1386_p8 = pnand %p1385_p11, %p1911_p1  ;;  %p1393_p2 = por %p1392_p12, %p1391_p4 }
 0x3b2   : > { %v453_v26 = vpack.c.bf16 %v452_v25, %v452_v25  ;;  %p1387_p3 = pneg %p1386_p8 }
 0x3b4   : > { %1154 = vmatmul.mubr.msk.bf16.vlgmr.msra.gmra.mxu0 %vm394_vm3, %v453_v26  ;;  %p1394_p7 = pnand %p1393_p2, %p1387_p3 }
 0x3b5   : > { %1165 = vmatprep.mubr.msk.bf16.mxu0 %vm1496_vm0, %v1495_v0 }
 0x400   : > { %v713_v34 = vpop.permute.xlu0 %712 }
 0x401   : > { %v718_v37 = vsel %vm457_vm4, %v713_v34, 0 }
 0x404   : > { %v845_v39 = vpop.permute.xlu0 %844 }
 0x405   : > { %v850_v42 = vsel %vm457_vm4, %v845_v39, 0 }
 0x415   : > { %v573_v27 = vpop.xlane.xlu1 %572 }
 0x416   : > { %1296 = vrcp.f32 %v573_v27 }
 0x41d   : > { %v705_v28 = vpop.xlane.xlu1 %704 }
 0x41e   : > { %1298 = vrcp.f32 %v705_v28 }
 0x423   : > { %v1297_v29 = vpop.eup %1296 }
 0x424   : > { %v575_v31 = vmul.f32 %v1297_v29, %v1289_v12 }
 0x425   : > { %v837_v30 = vpop.xlane.xlu1 %836 }
 0x426   : > { %1300 = vrcp.f32 %v837_v30  ;;  %v576_v35 = vpack.c.bf16 %v575_v31, %v575_v31 }
 0x429   : > { %v581_v32 = vpop.permute.xlu1 %580 }
 0x42a   : > { %v586_v33 = vsel %vm457_vm4, %v581_v32, 0 }
 0x42b   : > { %1164 = vmatpush3.bf16.msra.mxu0 %v586_v33  ;;  %v1299_v36 = vpop.eup %1298 }
 0x42c   : > { %1175 = vmatprep.subr.bf16.mxu0 %v1495_v0  ;;  %v707_v38 = vmul.f32 %v1299_v36, %v1291_v18 }
 0x42e   : > { %1166 = vmatmul.mubr.msk.bf16.vlgmr.msra.gmra.mxu0 %vm394_vm3, %v576_v35  ;;  %v708_v40 = vpack.c.bf16 %v707_v38, %v707_v38 }
 0x42f   : > { %1176 = vmatpush3.bf16.msra.mxu0 %v718_v37  ;;  %1177 = vmatprep.mubr.msk.bf16.mxu0 %vm1496_vm0, %v1495_v0 }
 0x430   : > { %1187 = vmatprep.subr.bf16.mxu0 %v1495_v0 }
 0x433   : > { %v1301_v41 = vpop.eup %1300 }
 0x434   : > { %v839_v43 = vmul.f32 %v1301_v41, %v1293_v20 }
 0x436   : > { %1178 = vmatmul.mubr.msk.bf16.vlgmr.msra.gmra.mxu0 %vm394_vm3, %v708_v40  ;;  %v840_v44 = vpack.c.bf16 %v839_v43, %v839_v43 }
 0x437   : > { %1188 = vmatpush3.bf16.msra.mxu0 %v850_v42  ;;  %1189 = vmatprep.mubr.msk.bf16.mxu0 %vm1496_vm0, %v1495_v0 }
 0x43e   : > { %1190 = vmatmul.mubr.msk.bf16.vlgmr.msra.gmra.mxu0 %vm394_vm3, %v840_v44 }
 0x474   : > { %v495_v45 = vpop.f32.mrf.mxu0 }
 0x475   : > { %501 = vst.msk [vmem:[%s1806_s12] sm:$0xff] %vm394_vm3, %v495_v45 }
 0x476   : > { %v1155_v46 = vpop.f32.mrf.mxu0 }
 0x478   : > { %v498_v47 = vpop.f32.mrf.mxu0 }
 0x47a   : > { %v1156_v48 = vpop.f32.mrf.mxu0 }
 0x4ee   : > { %v622_v49 = vpop.f32.mrf.mxu0 }
 0x4ef   : > { %629 = vrot.lane.b32.xlu0 %v622_v49, %s1502_s24 }
 0x4f0   : > { %v1167_v0 = vpop.f32.mrf.mxu0 }
 0x4f2   : > { %v625_v50 = vpop.f32.mrf.mxu0 }
 0x4f4   : > { %v1168_v51 = vpop.f32.mrf.mxu0 }
 0x4f6   : > { %v754_v52 = vpop.f32.mrf.mxu0 }
 0x4f7   : > { %761 = vrot.lane.b32.xlu0 %v754_v52, %s1503_s26 }
 0x4f8   : > { %v1179_v53 = vpop.f32.mrf.mxu0 }
 0x4f9   : > { %1397 = shalt.err (!%p1394_p7)
}
 0x4fa   : > { %s1398_s23 = scalar_lea.hbm %s1818_s7, 512  ;;  %s1402_s13 = scalar_lea.hbm %s1894_s5, 1024 }
 0x4fb   : > { %p1399_p13 = scmp.ne.s32.totalorder %s1818_s7, %s1398_s23  ;;  %p1403_p9 = scmp.lt.s32.totalorder %s1818_s7, %s1894_s5 }
 0x4fc   : > { %p1404_p0 = scmp.lt.s32.totalorder %s1402_s13, %s1398_s23 }
 0x4fd   : > { %p1400_p5 = pnand %p1399_p13, %p1911_p1 }
 0x4fe   : > { %p1405_p10 = por %p1404_p0, %p1403_p9 }
 0x4ff   : > { %p1401_p6 = pneg %p1400_p5 }
 0x501   : > { %p1406_p11 = pnand %p1405_p10, %p1401_p6 }
 0x503   : > { %1409 = shalt.err (!%p1406_p11)
}
 0x504   : > { %s1505_s8 = smov 128   ;;  %v757_v54 = vpop.f32.mrf.mxu0  ;;  %s1506_s14 = smov 24   ;;  %vm632_vm5 = vcmask 130112   ;;  %vm764_vm6 = vcmask 195712   ;;  %vm896_vm7 = vcmask 261312  }
 0x505   : > { %1202 = dma.vmem_to_hbm [thread:$0]  (%p1911_p1), %s1812_s28, 512, %s1818_s7, %s904_s27, %s1505_s8, %s1505_s8, %s1502_s24  }
 0x506   : > { %v1180_v55 = vpop.f32.mrf.mxu0  ;;  %s1110_s16 = sshll.u32 %s1613_s6, 7  ;;  %s917_s24 = sshll.u32 %s1806_s12, 4  ;;  %s918_s24 = int_to_ptr.vmem [resolvable:$true] %s917_s24 }
 0x507   : > { %s1851_s27 = scalar_lea.hbm %s1893_s4, %s1110_s16  ;;  %s899_s17 = scalar_lea.sflag [#allocation5], %s1698_s30 }
 0x508   : > { %v886_v56 = vpop.f32.mrf.mxu0  ;;  %s1410_s23 = scalar_lea.vmem %s918_s24, 128  ;;  %s1507_s10 = smov [#allocation9]  }
 0x509   : > { %893 = vrot.lane.b32.xlu1 %v886_v56, %s1506_s14  ;;  %p1411_p8 = scmp.ne.s32.totalorder %s918_s24, %s1410_s23  ;;  %s1414_s29 = sshll.u32 %s1507_s10, 4  ;;  %s1415_s29 = int_to_ptr.vmem [resolvable:$false] %s1414_s29 }
 0x50a   : > { %v1191_v57 = vpop.f32.mrf.mxu0  ;;  %s1416_s6 = scalar_lea.vmem %s1415_s29, 256  ;;  %p1417_p12 = scmp.lt.s32.totalorder %s918_s24, %s1415_s29 }
 0x50b   : > { %p1412_p3 = pnand %p1411_p8, %p1911_p1  ;;  %p1418_p2 = scmp.lt.s32.totalorder %s1416_s6, %s1410_s23 }
 0x50c   : > { %v889_v58 = vpop.f32.mrf.mxu0 }
 0x50d   : > { %p1413_p4 = pneg %p1412_p3  ;;  %p1419_p7 = por %p1418_p2, %p1417_p12 }
 0x50e   : > { %v1192_v59 = vpop.f32.mrf.mxu0 }
 0x50f   : > { %p1420_p13 = pnand %p1419_p7, %p1413_p4 }
 0x561   : > { %v630_v60 = vpop.permute.xlu0 %629 }
 0x562   : > { %633 = vst.msk [vmem:[%s1806_s12] sm:$0xff] %vm632_vm5, %v630_v60 }
 0x569   : > { %v762_v61 = vpop.permute.xlu0 %761 }
 0x56a   : > { %765 = vst.msk [vmem:[%s1806_s12] sm:$0xff] %vm764_vm6, %v762_v61 }
 0x57b   : > { %v894_v62 = vpop.permute.xlu1 %893 }
 0x57c   : > { %897 = vst.msk [vmem:[%s1806_s12] sm:$0xff] %vm896_vm7, %v894_v62 }
 0x57d   : > { %1423 = shalt.err (!%p1420_p13)
}
 0x57e   : > { %s1424_s12 = scalar_lea.hbm %s1851_s27, 128  ;;  %s1428_s15 = scalar_lea.hbm %s1893_s4, 256 }
 0x57f   : > { %p1425_p5 = scmp.ne.s32.totalorder %s1851_s27, %s1424_s12  ;;  %p1429_p0 = scmp.lt.s32.totalorder %s1851_s27, %s1893_s4 }
 0x580   : > { %p1430_p10 = scmp.lt.s32.totalorder %s1428_s15, %s1424_s12 }
 0x581   : > { %p1426_p6 = pnand %p1425_p5, %p1911_p1 }
 0x582   : > { %p1431_p11 = por %p1430_p10, %p1429_p0 }
 0x583   : > { %p1427_p9 = pneg %p1426_p6 }
 0x585   : > { %p1432_p8 = pnand %p1431_p11, %p1427_p9 }
 0x587   : > { %1435 = shalt.err (!%p1432_p8)
}
 0x588   : > { %1201 = dma.vmem_to_hbm [thread:$0]  (%p1911_p1), %s918_s24, 128, %s1851_s27, %s899_s17  }
 0x589 PF: > { %s945_s14 = sand.u32 1, %s1474_s18   ;;  %p1912_p3 = scmp.ne.s32.totalorder %s1904_s11, 0 }
 0x58a   : > { %p1913_p4 = scmp.ge.s32.totalorder %s1486_s21, 2  ;;  %s946_s16 = scalar_lea.sflag [#allocation5], %s945_s14 }
 0x58c   : > { %p1217_p12 = pnand %p1913_p4, %p1912_p3 }
 0x58e   : > { %p1218_p2 = pneg %p1217_p12 }
 0x590   : > { %1465 = dma.done.wait (%p1218_p2), %s946_s16, 128  }
 0x591   : > { %1467 = vsyncadd (%p1218_p2), %s946_s16, 4294967168  ;;  %s955_s28 = scalar_lea.sflag [#allocation11], %s945_s14 }
 0x592   : > { %1469 = dma.done.wait (%p1218_p2), %s955_s28, 512  }
 0x593   : > { %1471 = vsyncadd (%p1218_p2), %s955_s28, 4294966784  ;;  %p23_p1 = scmp.ge.s32.totalorder %s1559_s22, 4   ;;  %s1914_s18 = smov %s1478_s19 }
 0x594   : > { %s1915_s19 = smov %s1482_s20  ;;  %s1916_s20 = smov %s1570_s25 }
 0x595   : > { %s1917_s21 = smov %s1559_s22  ;;  %25 = sbr.rel (!%p23_p1) target bundleno = 8 (0x8), region = 121 }
 0x59a   :  { %960 = vsyncpa [#allocation4], 1 }
 0x59b   :  { %962 = vsyncpa [#allocation4 + $0x1], 1 }
 0x59c   :  { %963 = vsyncpa [#allocation7], 1 }
 0x59d   :  { %964 = vsyncpa [#allocation5], 1 }
 0x59e   :  { %966 = vsyncpa [#allocation5 + $0x1], 1 }
 0x59f   :  { %967 = vsyncpa [#allocation11], 1 }
 0x5a0   :  { %969 = vsyncpa [#allocation11 + $0x1], 1 }

</bundles_post_ra>
